<compile_context>
chip_gen: v7x
topology: tpu7x:2x2x1
jax: 0.10.0
libtpu: 0.0.40
codegen_flags: <defaults>
</compile_context>

<pallas_src>
import functools

import jax
import jax.numpy as jnp
from jax import lax
from jax.experimental import pallas as pl
from jax.experimental.pallas import tpu as pltpu

_LANE = 128
_SUBLANE = 8
_VMEM_LIMIT_BYTES = 56 * 1024 * 1024   # safe on v7x (64 MiB phys) and below
_VMEM_TILE_BUDGET = 44 * 1024 * 1024   # headroom for compiler scratch


def _round_up(x, m):
    return ((x + m - 1) // m) * m


def _pad_gate_groups(w, h, hp):
    """Pad each of the 4 gate column groups [f|i|z|r] from width h to hp."""
    if hp == h:
        return w
    groups = [w[..., g * h:(g + 1) * h] for g in range(4)]
    pad = [(0, 0)] * (w.ndim - 1) + [(0, hp - h)]
    return jnp.concatenate([jnp.pad(g, pad) for g in groups], axis=-1)


def _pad_to(x, shape):
    return jnp.pad(x, [(0, s - d) for d, s in zip(x.shape, shape)])


def _lstm_kernel(u_ref, h0_ref, c0_ref, wu_ref, bu_ref, wh_ref, wout_ref,
                 bout_ref, y_ref, h_sc, c_sc, up_sc, hk_hist,
                 *, hidden, block_t, unroll):
    """One grid step = `block_t` timesteps of the recurrence for one batch block.

    u_ref  : (TT, TB, F) raw inputs            wu_ref : (F, 4H)   bu_ref : (1, 4H)
    wh_ref : (H, 4H) recurrent weight          wout_ref : (H, O)  bout_ref : (1, O)
    y_ref  : (TT, TB, O)
    scratch: h_sc/c_sc (TB,H) carried state, up_sc (TT,TB,4H), hk_hist (TT,TB,H)
    """
    t_blk = pl.program_id(1)

    # First time block of this batch block: load the initial state.
    @pl.when(t_blk == 0)
    def _():
        h_sc[...] = h0_ref[...]
        c_sc[...] = c0_ref[...]

    H = hidden
    TB = h0_ref.shape[0]

    # Hoisted input projection for the whole time block: one big MXU pass
    # (TT*TB, F) @ (F, 4H) + bias, kept in VMEM scratch for the recurrence.
    up_sc[...] = lax.dot_general(
        u_ref[...], wu_ref[...],
        dimension_numbers=(((2,), (0,)), ((), ())),
        preferred_element_type=jnp.float32) + bu_ref[...]

    wh = wh_ref[...]                          # (H, 4H) stays resident

    # sigma(x) = 0.5*tanh(x/2) + 0.5  ->  one full-width lane-aligned tanh over
    # (TB, 4H) per step instead of 3 sliced sigmoids + 1 sliced tanh.
    col = lax.broadcasted_iota(jnp.int32, (1, 4 * H), 1)
    is_fiz = col < 3 * H
    pre = jnp.broadcast_to(jnp.where(is_fiz, 0.5, 1.0), (TB, 4 * H))   # hoisted
    off = jnp.broadcast_to(jnp.where(is_fiz, 0.5, 0.0), (TB, 4 * H))   # hoisted

    def step(k, carry):
        h, c = carry
        gates = up_sc[k] + jnp.dot(h.astype(wh.dtype), wh,
                                   preferred_element_type=jnp.float32)
        t_all = jnp.tanh(gates * pre)         # single EUP push
        adj = t_all * pre + off               # [sigmoid(fiz) | tanh(r)]
        f = adj[:, 0 * H:1 * H]
        i = adj[:, 1 * H:2 * H]
        z = adj[:, 2 * H:3 * H]
        r = adj[:, 3 * H:4 * H]
        ck = f * c + i * r
        hk = z * jnp.tanh(ck)
        hk_hist[k] = hk.astype(hk_hist.dtype)  # collect for batched out-proj
        return (hk, ck)

    h_fin, c_fin = lax.fori_loop(0, block_t, step, (h_sc[...], c_sc[...]),
                                 unroll=unroll)
    h_sc[...] = h_fin
    c_sc[...] = c_fin

    # Batched, lane-dense output projection: (TT*TB, H) @ (H, O) in one MXU
    # pass and a single unmasked slab store (O padded to a multiple of 128).
    y = lax.dot_general(hk_hist[...], wout_ref[...],
                        dimension_numbers=(((2,), (0,)), ((), ())),
                        preferred_element_type=jnp.float32)
    y_ref[...] = (y + bout_ref[...]).astype(y_ref.dtype)


def _pick_block_t(T, TB, F, Hp, Op, budget_bytes):
    """Largest time block that fits the VMEM budget (f32 accounting)."""
    b = 4
    fixed = b * (2 * Hp * 4 * Hp      # W_h (double-buffered by the pipeline)
                 + 2 * F * 4 * Hp     # W_u
                 + 2 * Hp * Op        # W_out
                 + 2 * (4 * Hp + Op)  # biases
                 + 4 * TB * Hp        # h0/c0 input blocks
                 + 2 * TB * Hp)       # h/c state scratch
    per_t = b * TB * (2 * F           # u block (double-buffered)
                      + 4 * Hp        # in-proj scratch
                      + Hp            # hk history scratch
                      + 2 * Op)       # y block (double-buffered)
    tt = (budget_bytes - fixed) // per_t
    return max(1, min(int(tt), T, 256))


def single_layer_lstm_forward(u_btf, h0, c0, params, *, mxu_dtype=jnp.float32):
    """u_btf: (B, T, in_features); h0, c0: (B, hidden). Returns (B, T, out)."""
    kernel_fiz, bias_fiz, kernel_r, bias_r, w_out, b_out = params
    B, T, F = u_btf.shape
    H = h0.shape[-1]
    O = w_out.shape[-1]

    # ---------------- tiling / padding decisions ----------------
    Hp = _round_up(H, _LANE)               # lane-aligned gate slices
    Op = _round_up(O, _LANE)               # lane-dense output stores
    B8 = _round_up(B, _SUBLANE)
    if B8 >= 2 * _SUBLANE:
        nB = 2                             # feed both TensorCores on v7x
        Bp = _round_up(B, 2 * _SUBLANE)
    else:
        nB = 1
        Bp = B8
    TB = Bp // nB

    TT = _pick_block_t(T, TB, F, Hp, Op, _VMEM_TILE_BUDGET)
    T_pad = _round_up(T, TT)
    nT = T_pad // TT

    gate_bytes = TB * 4 * Hp * 4
    if gate_bytes <= (64 << 10):
        unroll = min(TT, 8)
    elif gate_bytes <= (256 << 10):
        unroll = min(TT, 4)
    else:
        unroll = min(TT, 2)                # large live ranges -> avoid spills

    # ---------------- parameter prep ----------------
    # Fuse gate weights column-wise [fiz | r] -> [f|i|z|r], split rows into the
    # input part (F,4H) and the recurrent part (H,4H), pad gate groups to Hp.
    w_all = jnp.concatenate([kernel_fiz, kernel_r], axis=1)        # (F+H, 4H)
    w_u = _pad_gate_groups(w_all[:F], H, Hp)                       # (F, 4Hp)
    w_h = _pad_to(_pad_gate_groups(w_all[F:], H, Hp), (Hp, 4 * Hp))
    bias_all = _pad_gate_groups(
        jnp.concatenate([bias_fiz, bias_r], 0).reshape(1, 4 * H), H, Hp)
    w_o = _pad_to(w_out, (Hp, Op))
    b_o = _pad_to(b_out.reshape(1, O), (1, Op))

    w_h = w_h.astype(mxu_dtype)
    w_o = w_o.astype(mxu_dtype)

    # ---------------- activation prep ----------------
    u_tbf = _pad_to(jnp.transpose(u_btf, (1, 0, 2)), (T_pad, Bp, F))
    h0p = _pad_to(h0, (Bp, Hp))
    c0p = _pad_to(c0, (Bp, Hp))

    y_tbo = pl.pallas_call(
        functools.partial(_lstm_kernel, hidden=Hp, block_t=TT, unroll=unroll),
        out_shape=jax.ShapeDtypeStruct((T_pad, Bp, Op), jnp.float32),
        grid_spec=pltpu.PrefetchScalarGridSpec(
            num_scalar_prefetch=0,
            grid=(nB, nT),                          # (batch blk ||, time blk seq)
            in_specs=[
                pl.BlockSpec((TT, TB, F), lambda b, t: (t, b, 0)),   # u
                pl.BlockSpec((TB, Hp), lambda b, t: (b, 0)),         # h0
                pl.BlockSpec((TB, Hp), lambda b, t: (b, 0)),         # c0
                pl.BlockSpec((F, 4 * Hp), lambda b, t: (0, 0)),      # W_u
                pl.BlockSpec((1, 4 * Hp), lambda b, t: (0, 0)),      # bias
                pl.BlockSpec((Hp, 4 * Hp), lambda b, t: (0, 0)),     # W_h
                pl.BlockSpec((Hp, Op), lambda b, t: (0, 0)),         # W_out
                pl.BlockSpec((1, Op), lambda b, t: (0, 0)),          # b_out
            ],
            out_specs=pl.BlockSpec((TT, TB, Op), lambda b, t: (t, b, 0)),
            scratch_shapes=[
                pltpu.VMEM((TB, Hp), jnp.float32),           # h state (carried)
                pltpu.VMEM((TB, Hp), jnp.float32),           # c state (carried)
                pltpu.VMEM((TT, TB, 4 * Hp), jnp.float32),   # in-proj for block
                pltpu.VMEM((TT, TB, Hp), mxu_dtype),         # hk history
            ],
        ),
        compiler_params=pltpu.CompilerParams(
            dimension_semantics=("parallel", "arbitrary"),
            vmem_limit_bytes=_VMEM_LIMIT_BYTES),
    )(u_tbf, h0p, c0p, w_u, bias_all, w_h, w_o, b_o)

    # Drop time/batch/output padding; back to (B, T, O).
    return jnp.transpose(y_tbo[:T, :B, :O], (1, 0, 2))


def _reference_forward(u_btf, h0, c0, params):
    """Pure-JAX reference mirroring the PyTorch simulate() loop."""
    kernel_fiz, bias_fiz, kernel_r, bias_r, w_out, b_out = params
    H = h0.shape[-1]

    def step(carry, u_t):
        h, c = carry
        u_ = jnp.concatenate([u_t, h], axis=-1)
        fiz = jax.nn.sigmoid(u_ @ kernel_fiz + bias_fiz)
        f, i, z = fiz[:, :H], fiz[:, H:2 * H], fiz[:, 2 * H:]
        r = jnp.tanh(u_ @ kernel_r + bias_r)
        ck = f * c + i * r
        hk = z * jnp.tanh(ck)
        y = hk @ w_out + b_out
        return (hk, ck), y

    (_, _), ys = jax.lax.scan(step, (h0, c0), jnp.transpose(u_btf, (1, 0, 2)))
    return jnp.transpose(ys, (1, 0, 2))


def init_params(key, hidden, in_features, out_features):
    k1, k2, k3, k4 = jax.random.split(key, 4)
    fan = in_features + hidden
    # xavier_normal with gain=0.5: std = gain * sqrt(2 / (fan_in + fan_out))
    std_fiz = 0.5 * (2.0 / (fan + 3 * hidden)) ** 0.5
    std_r = 0.5 * (2.0 / (fan + hidden)) ** 0.5
    kernel_fiz = std_fiz * jax.random.normal(k1, (fan, 3 * hidden), jnp.float32)
    bias_fiz = jnp.zeros((3 * hidden,), jnp.float32)
    kernel_r = std_r * jax.random.normal(k2, (fan, hidden), jnp.float32)
    bias_r = jnp.zeros((hidden,), jnp.float32)
    # nn.Linear(hidden, out_features): uniform(-1/sqrt(hidden), 1/sqrt(hidden))
    bound = 1.0 / (hidden ** 0.5)
    w_out = jax.random.uniform(k3, (hidden, out_features), jnp.float32,
                               minval=-bound, maxval=bound)
    b_out = jax.random.uniform(k4, (out_features,), jnp.float32,
                               minval=-bound, maxval=bound)
    return (kernel_fiz, bias_fiz, kernel_r, bias_r, w_out, b_out)


if __name__ == "__main__":
    B, T, IN, HID, OUT = 2, 8, 4, 32, 4

    key = jax.random.PRNGKey(0)
    kp, ku, kh, kc = jax.random.split(key, 4)

    params = init_params(kp, HID, IN, OUT)
    u = jax.random.normal(ku, (B, T, IN), jnp.float32)
    # x0 supplied explicitly (h0 | c0) so the run is deterministic.
    h0 = jax.random.uniform(kh, (B, HID), jnp.float32)
    c0 = jax.random.uniform(kc, (B, HID), jnp.float32)

    y = single_layer_lstm_forward(u, h0, c0, params)
    y = jax.block_until_ready(y)

    y_ref = _reference_forward(u, h0, c0, params)
    assert y.shape == (B, T, OUT)
    assert jnp.allclose(y, y_ref, atol=1e-5, rtol=1e-5), "mismatch vs reference"

    print("KERNEL_OK")
</pallas_src>

<mosaic_0001>
module attributes {stable_mosaic.version = 11 : i64} {
  func.func @_lstm_kernel(%arg0: i32, %arg1: i32, %arg2: memref<8x8x4xf32, #tpu.memory_space<vmem>>, %arg3: memref<8x128xf32, #tpu.memory_space<vmem>>, %arg4: memref<8x128xf32, #tpu.memory_space<vmem>>, %arg5: memref<4x512xf32, #tpu.memory_space<vmem>>, %arg6: memref<1x512xf32, #tpu.memory_space<vmem>>, %arg7: memref<128x512xf32, #tpu.memory_space<vmem>>, %arg8: memref<128x128xf32, #tpu.memory_space<vmem>>, %arg9: memref<1x128xf32, #tpu.memory_space<vmem>>, %arg10: memref<8x8x128xf32, #tpu.memory_space<vmem>>, %arg11: memref<8x128xf32, #tpu.memory_space<vmem>>, %arg12: memref<8x128xf32, #tpu.memory_space<vmem>>, %arg13: memref<8x8x512xf32, #tpu.memory_space<vmem>>, %arg14: memref<8x8x128xf32, #tpu.memory_space<vmem>>) attributes {dimension_semantics = [#tpu.dimension_semantics<parallel>, #tpu.dimension_semantics<arbitrary>], iteration_bounds = array<i64: 1, 1>, scalar_prefetch = 0 : i64, scratch_operands = 4 : i64, tpu.core_type = #tpu.core_type<tc>, window_params = [{transform_indices = @transform_0, window_bounds = array<i64: 8, 8, 4>}, {transform_indices = @transform_1, window_bounds = array<i64: 8, 128>}, {transform_indices = @transform_2, window_bounds = array<i64: 8, 128>}, {pipeline_mode = #tpu.pipeline_mode<synchronous>, transform_indices = @transform_3, window_bounds = array<i64: 4, 512>}, {pipeline_mode = #tpu.pipeline_mode<synchronous>, transform_indices = @transform_4, window_bounds = array<i64: 1, 512>}, {pipeline_mode = #tpu.pipeline_mode<synchronous>, transform_indices = @transform_5, window_bounds = array<i64: 128, 512>}, {pipeline_mode = #tpu.pipeline_mode<synchronous>, transform_indices = @transform_6, window_bounds = array<i64: 128, 128>}, {pipeline_mode = #tpu.pipeline_mode<synchronous>, transform_indices = @transform_7, window_bounds = array<i64: 1, 128>}, {transform_indices = @transform_8, window_bounds = array<i64: 8, 8, 128>}]} {
    %c0_i32 = arith.constant 0 : i32
    %0 = arith.cmpi eq, %arg1, %c0_i32 : i32
    %1 = arith.extui %0 : i1 to i32
    %c0_i32_0 = arith.constant 0 : i32
    %2 = arith.cmpi ne, %1, %c0_i32_0 : i32
    scf.if %2 {
      %c0_76 = arith.constant 0 : index
      %c0_77 = arith.constant 0 : index
      %213 = vector.load %arg3[%c0_76, %c0_77] : memref<8x128xf32, #tpu.memory_space<vmem>>, vector<8x128xf32>
      %c0_78 = arith.constant 0 : index
      %c0_79 = arith.constant 0 : index
      %214 = vector.load %arg11[%c0_78, %c0_79] : memref<8x128xf32, #tpu.memory_space<vmem>>, vector<8x128xf32>
      tpu.vector_store %arg11[%c0_78, %c0_79], %213 {strides = array<i32>} : memref<8x128xf32, #tpu.memory_space<vmem>>, vector<8x128xf32>,
      %c0_80 = arith.constant 0 : index
      %c0_81 = arith.constant 0 : index
      %215 = vector.load %arg4[%c0_80, %c0_81] : memref<8x128xf32, #tpu.memory_space<vmem>>, vector<8x128xf32>
      %c0_82 = arith.constant 0 : index
      %c0_83 = arith.constant 0 : index
      %216 = vector.load %arg12[%c0_82, %c0_83] : memref<8x128xf32, #tpu.memory_space<vmem>>, vector<8x128xf32>
      tpu.vector_store %arg12[%c0_82, %c0_83], %215 {strides = array<i32>} : memref<8x128xf32, #tpu.memory_space<vmem>>, vector<8x128xf32>,
    } else {
    }
    %c0 = arith.constant 0 : index
    %c0_1 = arith.constant 0 : index
    %c0_2 = arith.constant 0 : index
    %3 = vector.load %arg2[%c0, %c0_1, %c0_2] : memref<8x8x4xf32, #tpu.memory_space<vmem>>, vector<8x8x4xf32>
    %c0_3 = arith.constant 0 : index
    %c0_4 = arith.constant 0 : index
    %4 = vector.load %arg5[%c0_3, %c0_4] : memref<4x512xf32, #tpu.memory_space<vmem>>, vector<4x512xf32>
    %cst = arith.constant dense<0.000000e+00> : vector<8x8x512xf32>
    %5 = tpu.matmul %3, %4, %cst {dimension_numbers = #tpu.dot_dimension_numbers<[2], [0], [0, 1], [1], [0, 0, 0, 1, 1, 1], [], []>} : vector<8x8x4xf32>, vector<4x512xf32>, vector<8x8x512xf32> -> vector<8x8x512xf32>
    %c0_5 = arith.constant 0 : index
    %c0_6 = arith.constant 0 : index
    %6 = vector.load %arg6[%c0_5, %c0_6] : memref<1x512xf32, #tpu.memory_space<vmem>>, vector<1x512xf32>
    %7 = vector.shape_cast %6 : vector<1x512xf32> to vector<1x1x512xf32>
    %8 = vector.broadcast %7 : vector<1x1x512xf32> to vector<8x8x512xf32>
    %9 = arith.addf %5, %8 : vector<8x8x512xf32>
    %c0_7 = arith.constant 0 : index
    %c0_8 = arith.constant 0 : index
    %c0_9 = arith.constant 0 : index
    %10 = vector.load %arg13[%c0_7, %c0_8, %c0_9] : memref<8x8x512xf32, #tpu.memory_space<vmem>>, vector<8x8x512xf32>
    tpu.vector_store %arg13[%c0_7, %c0_8, %c0_9], %9 {strides = array<i32>} : memref<8x8x512xf32, #tpu.memory_space<vmem>>, vector<8x8x512xf32>,
    %c0_10 = arith.constant 0 : index
    %c0_11 = arith.constant 0 : index
    %11 = vector.load %arg7[%c0_10, %c0_11] : memref<128x512xf32, #tpu.memory_space<vmem>>, vector<128x512xf32>
    %12 = tpu.iota {dimensions = array<i32: 1>} : vector<1x512xi32>
    %c384_i32 = arith.constant 384 : i32
    %13 = vector.broadcast %c384_i32 : i32 to vector<1x512xi32>
    %14 = arith.cmpi slt, %12, %13 : vector<1x512xi32>
    %cst_12 = arith.constant 5.000000e-01 : f32
    %cst_13 = arith.constant 1.000000e+00 : f32
    %15 = vector.broadcast %cst_12 : f32 to vector<1x512xf32>
    %16 = vector.broadcast %cst_13 : f32 to vector<1x512xf32>
    %17 = arith.select %14, %15, %16 : vector<1x512xi1>, vector<1x512xf32>
    %18 = vector.shape_cast %17 : vector<1x512xf32> to vector<1x512xf32>
    %19 = vector.broadcast %18 : vector<1x512xf32> to vector<8x512xf32>
    %cst_14 = arith.constant 5.000000e-01 : f32
    %cst_15 = arith.constant 0.000000e+00 : f32
    %20 = vector.broadcast %cst_14 : f32 to vector<1x512xf32>
    %21 = vector.broadcast %cst_15 : f32 to vector<1x512xf32>
    %22 = arith.select %14, %20, %21 : vector<1x512xi1>, vector<1x512xf32>
    %23 = vector.shape_cast %22 : vector<1x512xf32> to vector<1x512xf32>
    %24 = vector.broadcast %23 : vector<1x512xf32> to vector<8x512xf32>
    %c0_16 = arith.constant 0 : index
    %c0_17 = arith.constant 0 : index
    %25 = vector.load %arg11[%c0_16, %c0_17] : memref<8x128xf32, #tpu.memory_space<vmem>>, vector<8x128xf32>
    %c0_18 = arith.constant 0 : index
    %c0_19 = arith.constant 0 : index
    %26 = vector.load %arg12[%c0_18, %c0_19] : memref<8x128xf32, #tpu.memory_space<vmem>>, vector<8x128xf32>
    %c0_i32_20 = arith.constant 0 : i32
    %27 = arith.index_cast %c0_i32_20 : i32 to index
    %c0_21 = arith.constant 0 : index
    %c0_22 = arith.constant 0 : index
    %28 = vector.load %arg13[%27, %c0_21, %c0_22] : memref<8x8x512xf32, #tpu.memory_space<vmem>>, vector<1x8x512xf32>
    %29 = vector.shape_cast %28 : vector<1x8x512xf32> to vector<8x512xf32>
    %cst_23 = arith.constant dense<0.000000e+00> : vector<8x512xf32>
    %30 = tpu.matmul %25, %11, %cst_23 {dimension_numbers = #tpu.dot_dimension_numbers<[1], [0], [0], [1], [0, 0, 1, 1], [], []>} : vector<8x128xf32>, vector<128x512xf32>, vector<8x512xf32> -> vector<8x512xf32>
    %31 = arith.addf %29, %30 : vector<8x512xf32>
    %32 = arith.mulf %31, %19 : vector<8x512xf32>
    %33 = math.tanh %32 : vector<8x512xf32>
    %34 = arith.mulf %33, %19 : vector<8x512xf32>
    %35 = arith.addf %34, %24 : vector<8x512xf32>
    %36 = vector.extract_strided_slice %35 {offsets = [0, 0], sizes = [8, 128], strides = [1, 1]} : vector<8x512xf32> to vector<8x128xf32>
    %37 = vector.extract_strided_slice %35 {offsets = [0, 128], sizes = [8, 128], strides = [1, 1]} : vector<8x512xf32> to vector<8x128xf32>
    %38 = vector.extract_strided_slice %35 {offsets = [0, 256], sizes = [8, 128], strides = [1, 1]} : vector<8x512xf32> to vector<8x128xf32>
    %39 = vector.extract_strided_slice %35 {offsets = [0, 384], sizes = [8, 128], strides = [1, 1]} : vector<8x512xf32> to vector<8x128xf32>
    %40 = arith.mulf %36, %26 : vector<8x128xf32>
    %41 = arith.mulf %37, %39 : vector<8x128xf32>
    %42 = arith.addf %40, %41 : vector<8x128xf32>
    %43 = math.tanh %42 : vector<8x128xf32>
    %44 = arith.mulf %38, %43 : vector<8x128xf32>
    %45 = arith.index_cast %c0_i32_20 : i32 to index
    %c0_24 = arith.constant 0 : index
    %c0_25 = arith.constant 0 : index
    %46 = vector.load %arg14[%45, %c0_24, %c0_25] : memref<8x8x128xf32, #tpu.memory_space<vmem>>, vector<1x8x128xf32>
    %47 = vector.shape_cast %46 : vector<1x8x128xf32> to vector<8x128xf32>
    %48 = vector.shape_cast %44 : vector<8x128xf32> to vector<1x8x128xf32>
    tpu.vector_store %arg14[%45, %c0_24, %c0_25], %48 {strides = array<i32>} : memref<8x8x128xf32, #tpu.memory_space<vmem>>, vector<1x8x128xf32>,
    %c1_i32 = arith.constant 1 : i32
    %49 = arith.index_cast %c1_i32 : i32 to index
    %c0_26 = arith.constant 0 : index
    %c0_27 = arith.constant 0 : index
    %50 = vector.load %arg13[%49, %c0_26, %c0_27] : memref<8x8x512xf32, #tpu.memory_space<vmem>>, vector<1x8x512xf32>
    %51 = vector.shape_cast %50 : vector<1x8x512xf32> to vector<8x512xf32>
    %cst_28 = arith.constant dense<0.000000e+00> : vector<8x512xf32>
    %52 = tpu.matmul %44, %11, %cst_28 {dimension_numbers = #tpu.dot_dimension_numbers<[1], [0], [0], [1], [0, 0, 1, 1], [], []>} : vector<8x128xf32>, vector<128x512xf32>, vector<8x512xf32> -> vector<8x512xf32>
    %53 = arith.addf %51, %52 : vector<8x512xf32>
    %54 = arith.mulf %53, %19 : vector<8x512xf32>
    %55 = math.tanh %54 : vector<8x512xf32>
    %56 = arith.mulf %55, %19 : vector<8x512xf32>
    %57 = arith.addf %56, %24 : vector<8x512xf32>
    %58 = vector.extract_strided_slice %57 {offsets = [0, 0], sizes = [8, 128], strides = [1, 1]} : vector<8x512xf32> to vector<8x128xf32>
    %59 = vector.extract_strided_slice %57 {offsets = [0, 128], sizes = [8, 128], strides = [1, 1]} : vector<8x512xf32> to vector<8x128xf32>
    %60 = vector.extract_strided_slice %57 {offsets = [0, 256], sizes = [8, 128], strides = [1, 1]} : vector<8x512xf32> to vector<8x128xf32>
    %61 = vector.extract_strided_slice %57 {offsets = [0, 384], sizes = [8, 128], strides = [1, 1]} : vector<8x512xf32> to vector<8x128xf32>
    %62 = arith.mulf %58, %42 : vector<8x128xf32>
    %63 = arith.mulf %59, %61 : vector<8x128xf32>
    %64 = arith.addf %62, %63 : vector<8x128xf32>
    %65 = math.tanh %64 : vector<8x128xf32>
    %66 = arith.mulf %60, %65 : vector<8x128xf32>
    %67 = arith.index_cast %c1_i32 : i32 to index
    %c0_29 = arith.constant 0 : index
    %c0_30 = arith.constant 0 : index
    %68 = vector.load %arg14[%67, %c0_29, %c0_30] : memref<8x8x128xf32, #tpu.memory_space<vmem>>, vector<1x8x128xf32>
    %69 = vector.shape_cast %68 : vector<1x8x128xf32> to vector<8x128xf32>
    %70 = vector.shape_cast %66 : vector<8x128xf32> to vector<1x8x128xf32>
    tpu.vector_store %arg14[%67, %c0_29, %c0_30], %70 {strides = array<i32>} : memref<8x8x128xf32, #tpu.memory_space<vmem>>, vector<1x8x128xf32>,
    %c2_i32 = arith.constant 2 : i32
    %71 = arith.index_cast %c2_i32 : i32 to index
    %c0_31 = arith.constant 0 : index
    %c0_32 = arith.constant 0 : index
    %72 = vector.load %arg13[%71, %c0_31, %c0_32] : memref<8x8x512xf32, #tpu.memory_space<vmem>>, vector<1x8x512xf32>
    %73 = vector.shape_cast %72 : vector<1x8x512xf32> to vector<8x512xf32>
    %cst_33 = arith.constant dense<0.000000e+00> : vector<8x512xf32>
    %74 = tpu.matmul %66, %11, %cst_33 {dimension_numbers = #tpu.dot_dimension_numbers<[1], [0], [0], [1], [0, 0, 1, 1], [], []>} : vector<8x128xf32>, vector<128x512xf32>, vector<8x512xf32> -> vector<8x512xf32>
    %75 = arith.addf %73, %74 : vector<8x512xf32>
    %76 = arith.mulf %75, %19 : vector<8x512xf32>
    %77 = math.tanh %76 : vector<8x512xf32>
    %78 = arith.mulf %77, %19 : vector<8x512xf32>
    %79 = arith.addf %78, %24 : vector<8x512xf32>
    %80 = vector.extract_strided_slice %79 {offsets = [0, 0], sizes = [8, 128], strides = [1, 1]} : vector<8x512xf32> to vector<8x128xf32>
    %81 = vector.extract_strided_slice %79 {offsets = [0, 128], sizes = [8, 128], strides = [1, 1]} : vector<8x512xf32> to vector<8x128xf32>
    %82 = vector.extract_strided_slice %79 {offsets = [0, 256], sizes = [8, 128], strides = [1, 1]} : vector<8x512xf32> to vector<8x128xf32>
    %83 = vector.extract_strided_slice %79 {offsets = [0, 384], sizes = [8, 128], strides = [1, 1]} : vector<8x512xf32> to vector<8x128xf32>
    %84 = arith.mulf %80, %64 : vector<8x128xf32>
    %85 = arith.mulf %81, %83 : vector<8x128xf32>
    %86 = arith.addf %84, %85 : vector<8x128xf32>
    %87 = math.tanh %86 : vector<8x128xf32>
    %88 = arith.mulf %82, %87 : vector<8x128xf32>
    %89 = arith.index_cast %c2_i32 : i32 to index
    %c0_34 = arith.constant 0 : index
    %c0_35 = arith.constant 0 : index
    %90 = vector.load %arg14[%89, %c0_34, %c0_35] : memref<8x8x128xf32, #tpu.memory_space<vmem>>, vector<1x8x128xf32>
    %91 = vector.shape_cast %90 : vector<1x8x128xf32> to vector<8x128xf32>
    %92 = vector.shape_cast %88 : vector<8x128xf32> to vector<1x8x128xf32>
    tpu.vector_store %arg14[%89, %c0_34, %c0_35], %92 {strides = array<i32>} : memref<8x8x128xf32, #tpu.memory_space<vmem>>, vector<1x8x128xf32>,
    %c3_i32 = arith.constant 3 : i32
    %93 = arith.index_cast %c3_i32 : i32 to index
    %c0_36 = arith.constant 0 : index
    %c0_37 = arith.constant 0 : index
    %94 = vector.load %arg13[%93, %c0_36, %c0_37] : memref<8x8x512xf32, #tpu.memory_space<vmem>>, vector<1x8x512xf32>
    %95 = vector.shape_cast %94 : vector<1x8x512xf32> to vector<8x512xf32>
    %cst_38 = arith.constant dense<0.000000e+00> : vector<8x512xf32>
    %96 = tpu.matmul %88, %11, %cst_38 {dimension_numbers = #tpu.dot_dimension_numbers<[1], [0], [0], [1], [0, 0, 1, 1], [], []>} : vector<8x128xf32>, vector<128x512xf32>, vector<8x512xf32> -> vector<8x512xf32>
    %97 = arith.addf %95, %96 : vector<8x512xf32>
    %98 = arith.mulf %97, %19 : vector<8x512xf32>
    %99 = math.tanh %98 : vector<8x512xf32>
    %100 = arith.mulf %99, %19 : vector<8x512xf32>
    %101 = arith.addf %100, %24 : vector<8x512xf32>
    %102 = vector.extract_strided_slice %101 {offsets = [0, 0], sizes = [8, 128], strides = [1, 1]} : vector<8x512xf32> to vector<8x128xf32>
    %103 = vector.extract_strided_slice %101 {offsets = [0, 128], sizes = [8, 128], strides = [1, 1]} : vector<8x512xf32> to vector<8x128xf32>
    %104 = vector.extract_strided_slice %101 {offsets = [0, 256], sizes = [8, 128], strides = [1, 1]} : vector<8x512xf32> to vector<8x128xf32>
    %105 = vector.extract_strided_slice %101 {offsets = [0, 384], sizes = [8, 128], strides = [1, 1]} : vector<8x512xf32> to vector<8x128xf32>
    %106 = arith.mulf %102, %86 : vector<8x128xf32>
    %107 = arith.mulf %103, %105 : vector<8x128xf32>
    %108 = arith.addf %106, %107 : vector<8x128xf32>
    %109 = math.tanh %108 : vector<8x128xf32>
    %110 = arith.mulf %104, %109 : vector<8x128xf32>
    %111 = arith.index_cast %c3_i32 : i32 to index
    %c0_39 = arith.constant 0 : index
    %c0_40 = arith.constant 0 : index
    %112 = vector.load %arg14[%111, %c0_39, %c0_40] : memref<8x8x128xf32, #tpu.memory_space<vmem>>, vector<1x8x128xf32>
    %113 = vector.shape_cast %112 : vector<1x8x128xf32> to vector<8x128xf32>
    %114 = vector.shape_cast %110 : vector<8x128xf32> to vector<1x8x128xf32>
    tpu.vector_store %arg14[%111, %c0_39, %c0_40], %114 {strides = array<i32>} : memref<8x8x128xf32, #tpu.memory_space<vmem>>, vector<1x8x128xf32>,
    %c4_i32 = arith.constant 4 : i32
    %115 = arith.index_cast %c4_i32 : i32 to index
    %c0_41 = arith.constant 0 : index
    %c0_42 = arith.constant 0 : index
    %116 = vector.load %arg13[%115, %c0_41, %c0_42] : memref<8x8x512xf32, #tpu.memory_space<vmem>>, vector<1x8x512xf32>
    %117 = vector.shape_cast %116 : vector<1x8x512xf32> to vector<8x512xf32>
    %cst_43 = arith.constant dense<0.000000e+00> : vector<8x512xf32>
    %118 = tpu.matmul %110, %11, %cst_43 {dimension_numbers = #tpu.dot_dimension_numbers<[1], [0], [0], [1], [0, 0, 1, 1], [], []>} : vector<8x128xf32>, vector<128x512xf32>, vector<8x512xf32> -> vector<8x512xf32>
    %119 = arith.addf %117, %118 : vector<8x512xf32>
    %120 = arith.mulf %119, %19 : vector<8x512xf32>
    %121 = math.tanh %120 : vector<8x512xf32>
    %122 = arith.mulf %121, %19 : vector<8x512xf32>
    %123 = arith.addf %122, %24 : vector<8x512xf32>
    %124 = vector.extract_strided_slice %123 {offsets = [0, 0], sizes = [8, 128], strides = [1, 1]} : vector<8x512xf32> to vector<8x128xf32>
    %125 = vector.extract_strided_slice %123 {offsets = [0, 128], sizes = [8, 128], strides = [1, 1]} : vector<8x512xf32> to vector<8x128xf32>
    %126 = vector.extract_strided_slice %123 {offsets = [0, 256], sizes = [8, 128], strides = [1, 1]} : vector<8x512xf32> to vector<8x128xf32>
    %127 = vector.extract_strided_slice %123 {offsets = [0, 384], sizes = [8, 128], strides = [1, 1]} : vector<8x512xf32> to vector<8x128xf32>
    %128 = arith.mulf %124, %108 : vector<8x128xf32>
    %129 = arith.mulf %125, %127 : vector<8x128xf32>
    %130 = arith.addf %128, %129 : vector<8x128xf32>
    %131 = math.tanh %130 : vector<8x128xf32>
    %132 = arith.mulf %126, %131 : vector<8x128xf32>
    %133 = arith.index_cast %c4_i32 : i32 to index
    %c0_44 = arith.constant 0 : index
    %c0_45 = arith.constant 0 : index
    %134 = vector.load %arg14[%133, %c0_44, %c0_45] : memref<8x8x128xf32, #tpu.memory_space<vmem>>, vector<1x8x128xf32>
    %135 = vector.shape_cast %134 : vector<1x8x128xf32> to vector<8x128xf32>
    %136 = vector.shape_cast %132 : vector<8x128xf32> to vector<1x8x128xf32>
    tpu.vector_store %arg14[%133, %c0_44, %c0_45], %136 {strides = array<i32>} : memref<8x8x128xf32, #tpu.memory_space<vmem>>, vector<1x8x128xf32>,
    %c5_i32 = arith.constant 5 : i32
    %137 = arith.index_cast %c5_i32 : i32 to index
    %c0_46 = arith.constant 0 : index
    %c0_47 = arith.constant 0 : index
    %138 = vector.load %arg13[%137, %c0_46, %c0_47] : memref<8x8x512xf32, #tpu.memory_space<vmem>>, vector<1x8x512xf32>
    %139 = vector.shape_cast %138 : vector<1x8x512xf32> to vector<8x512xf32>
    %cst_48 = arith.constant dense<0.000000e+00> : vector<8x512xf32>
    %140 = tpu.matmul %132, %11, %cst_48 {dimension_numbers = #tpu.dot_dimension_numbers<[1], [0], [0], [1], [0, 0, 1, 1], [], []>} : vector<8x128xf32>, vector<128x512xf32>, vector<8x512xf32> -> vector<8x512xf32>
    %141 = arith.addf %139, %140 : vector<8x512xf32>
    %142 = arith.mulf %141, %19 : vector<8x512xf32>
    %143 = math.tanh %142 : vector<8x512xf32>
    %144 = arith.mulf %143, %19 : vector<8x512xf32>
    %145 = arith.addf %144, %24 : vector<8x512xf32>
    %146 = vector.extract_strided_slice %145 {offsets = [0, 0], sizes = [8, 128], strides = [1, 1]} : vector<8x512xf32> to vector<8x128xf32>
    %147 = vector.extract_strided_slice %145 {offsets = [0, 128], sizes = [8, 128], strides = [1, 1]} : vector<8x512xf32> to vector<8x128xf32>
    %148 = vector.extract_strided_slice %145 {offsets = [0, 256], sizes = [8, 128], strides = [1, 1]} : vector<8x512xf32> to vector<8x128xf32>
    %149 = vector.extract_strided_slice %145 {offsets = [0, 384], sizes = [8, 128], strides = [1, 1]} : vector<8x512xf32> to vector<8x128xf32>
    %150 = arith.mulf %146, %130 : vector<8x128xf32>
    %151 = arith.mulf %147, %149 : vector<8x128xf32>
    %152 = arith.addf %150, %151 : vector<8x128xf32>
    %153 = math.tanh %152 : vector<8x128xf32>
    %154 = arith.mulf %148, %153 : vector<8x128xf32>
    %155 = arith.index_cast %c5_i32 : i32 to index
    %c0_49 = arith.constant 0 : index
    %c0_50 = arith.constant 0 : index
    %156 = vector.load %arg14[%155, %c0_49, %c0_50] : memref<8x8x128xf32, #tpu.memory_space<vmem>>, vector<1x8x128xf32>
    %157 = vector.shape_cast %156 : vector<1x8x128xf32> to vector<8x128xf32>
    %158 = vector.shape_cast %154 : vector<8x128xf32> to vector<1x8x128xf32>
    tpu.vector_store %arg14[%155, %c0_49, %c0_50], %158 {strides = array<i32>} : memref<8x8x128xf32, #tpu.memory_space<vmem>>, vector<1x8x128xf32>,
    %c6_i32 = arith.constant 6 : i32
    %159 = arith.index_cast %c6_i32 : i32 to index
    %c0_51 = arith.constant 0 : index
    %c0_52 = arith.constant 0 : index
    %160 = vector.load %arg13[%159, %c0_51, %c0_52] : memref<8x8x512xf32, #tpu.memory_space<vmem>>, vector<1x8x512xf32>
    %161 = vector.shape_cast %160 : vector<1x8x512xf32> to vector<8x512xf32>
    %cst_53 = arith.constant dense<0.000000e+00> : vector<8x512xf32>
    %162 = tpu.matmul %154, %11, %cst_53 {dimension_numbers = #tpu.dot_dimension_numbers<[1], [0], [0], [1], [0, 0, 1, 1], [], []>} : vector<8x128xf32>, vector<128x512xf32>, vector<8x512xf32> -> vector<8x512xf32>
    %163 = arith.addf %161, %162 : vector<8x512xf32>
    %164 = arith.mulf %163, %19 : vector<8x512xf32>
    %165 = math.tanh %164 : vector<8x512xf32>
    %166 = arith.mulf %165, %19 : vector<8x512xf32>
    %167 = arith.addf %166, %24 : vector<8x512xf32>
    %168 = vector.extract_strided_slice %167 {offsets = [0, 0], sizes = [8, 128], strides = [1, 1]} : vector<8x512xf32> to vector<8x128xf32>
    %169 = vector.extract_strided_slice %167 {offsets = [0, 128], sizes = [8, 128], strides = [1, 1]} : vector<8x512xf32> to vector<8x128xf32>
    %170 = vector.extract_strided_slice %167 {offsets = [0, 256], sizes = [8, 128], strides = [1, 1]} : vector<8x512xf32> to vector<8x128xf32>
    %171 = vector.extract_strided_slice %167 {offsets = [0, 384], sizes = [8, 128], strides = [1, 1]} : vector<8x512xf32> to vector<8x128xf32>
    %172 = arith.mulf %168, %152 : vector<8x128xf32>
    %173 = arith.mulf %169, %171 : vector<8x128xf32>
    %174 = arith.addf %172, %173 : vector<8x128xf32>
    %175 = math.tanh %174 : vector<8x128xf32>
    %176 = arith.mulf %170, %175 : vector<8x128xf32>
    %177 = arith.index_cast %c6_i32 : i32 to index
    %c0_54 = arith.constant 0 : index
    %c0_55 = arith.constant 0 : index
    %178 = vector.load %arg14[%177, %c0_54, %c0_55] : memref<8x8x128xf32, #tpu.memory_space<vmem>>, vector<1x8x128xf32>
    %179 = vector.shape_cast %178 : vector<1x8x128xf32> to vector<8x128xf32>
    %180 = vector.shape_cast %176 : vector<8x128xf32> to vector<1x8x128xf32>
    tpu.vector_store %arg14[%177, %c0_54, %c0_55], %180 {strides = array<i32>} : memref<8x8x128xf32, #tpu.memory_space<vmem>>, vector<1x8x128xf32>,
    %c7_i32 = arith.constant 7 : i32
    %181 = arith.index_cast %c7_i32 : i32 to index
    %c0_56 = arith.constant 0 : index
    %c0_57 = arith.constant 0 : index
    %182 = vector.load %arg13[%181, %c0_56, %c0_57] : memref<8x8x512xf32, #tpu.memory_space<vmem>>, vector<1x8x512xf32>
    %183 = vector.shape_cast %182 : vector<1x8x512xf32> to vector<8x512xf32>
    %cst_58 = arith.constant dense<0.000000e+00> : vector<8x512xf32>
    %184 = tpu.matmul %176, %11, %cst_58 {dimension_numbers = #tpu.dot_dimension_numbers<[1], [0], [0], [1], [0, 0, 1, 1], [], []>} : vector<8x128xf32>, vector<128x512xf32>, vector<8x512xf32> -> vector<8x512xf32>
    %185 = arith.addf %183, %184 : vector<8x512xf32>
    %186 = arith.mulf %185, %19 : vector<8x512xf32>
    %187 = math.tanh %186 : vector<8x512xf32>
    %188 = arith.mulf %187, %19 : vector<8x512xf32>
    %189 = arith.addf %188, %24 : vector<8x512xf32>
    %190 = vector.extract_strided_slice %189 {offsets = [0, 0], sizes = [8, 128], strides = [1, 1]} : vector<8x512xf32> to vector<8x128xf32>
    %191 = vector.extract_strided_slice %189 {offsets = [0, 128], sizes = [8, 128], strides = [1, 1]} : vector<8x512xf32> to vector<8x128xf32>
    %192 = vector.extract_strided_slice %189 {offsets = [0, 256], sizes = [8, 128], strides = [1, 1]} : vector<8x512xf32> to vector<8x128xf32>
    %193 = vector.extract_strided_slice %189 {offsets = [0, 384], sizes = [8, 128], strides = [1, 1]} : vector<8x512xf32> to vector<8x128xf32>
    %194 = arith.mulf %190, %174 : vector<8x128xf32>
    %195 = arith.mulf %191, %193 : vector<8x128xf32>
    %196 = arith.addf %194, %195 : vector<8x128xf32>
    %197 = math.tanh %196 : vector<8x128xf32>
    %198 = arith.mulf %192, %197 : vector<8x128xf32>
    %199 = arith.index_cast %c7_i32 : i32 to index
    %c0_59 = arith.constant 0 : index
    %c0_60 = arith.constant 0 : index
    %200 = vector.load %arg14[%199, %c0_59, %c0_60] : memref<8x8x128xf32, #tpu.memory_space<vmem>>, vector<1x8x128xf32>
    %201 = vector.shape_cast %200 : vector<1x8x128xf32> to vector<8x128xf32>
    %202 = vector.shape_cast %198 : vector<8x128xf32> to vector<1x8x128xf32>
    tpu.vector_store %arg14[%199, %c0_59, %c0_60], %202 {strides = array<i32>} : memref<8x8x128xf32, #tpu.memory_space<vmem>>, vector<1x8x128xf32>,
    %c8_i32 = arith.constant 8 : i32
    %c0_61 = arith.constant 0 : index
    %c0_62 = arith.constant 0 : index
    %203 = vector.load %arg11[%c0_61, %c0_62] : memref<8x128xf32, #tpu.memory_space<vmem>>, vector<8x128xf32>
    tpu.vector_store %arg11[%c0_61, %c0_62], %198 {strides = array<i32>} : memref<8x128xf32, #tpu.memory_space<vmem>>, vector<8x128xf32>,
    %c0_63 = arith.constant 0 : index
    %c0_64 = arith.constant 0 : index
    %204 = vector.load %arg12[%c0_63, %c0_64] : memref<8x128xf32, #tpu.memory_space<vmem>>, vector<8x128xf32>
    tpu.vector_store %arg12[%c0_63, %c0_64], %196 {strides = array<i32>} : memref<8x128xf32, #tpu.memory_space<vmem>>, vector<8x128xf32>,
    %c0_65 = arith.constant 0 : index
    %c0_66 = arith.constant 0 : index
    %c0_67 = arith.constant 0 : index
    %205 = vector.load %arg14[%c0_65, %c0_66, %c0_67] : memref<8x8x128xf32, #tpu.memory_space<vmem>>, vector<8x8x128xf32>
    %c0_68 = arith.constant 0 : index
    %c0_69 = arith.constant 0 : index
    %206 = vector.load %arg8[%c0_68, %c0_69] : memref<128x128xf32, #tpu.memory_space<vmem>>, vector<128x128xf32>
    %cst_70 = arith.constant dense<0.000000e+00> : vector<8x8x128xf32>
    %207 = tpu.matmul %205, %206, %cst_70 {dimension_numbers = #tpu.dot_dimension_numbers<[2], [0], [0, 1], [1], [0, 0, 0, 1, 1, 1], [], []>} : vector<8x8x128xf32>, vector<128x128xf32>, vector<8x8x128xf32> -> vector<8x8x128xf32>
    %c0_71 = arith.constant 0 : index
    %c0_72 = arith.constant 0 : index
    %208 = vector.load %arg9[%c0_71, %c0_72] : memref<1x128xf32, #tpu.memory_space<vmem>>, vector<1x128xf32>
    %209 = vector.shape_cast %208 : vector<1x128xf32> to vector<1x1x128xf32>
    %210 = vector.broadcast %209 : vector<1x1x128xf32> to vector<8x8x128xf32>
    %211 = arith.addf %207, %210 : vector<8x8x128xf32>
    %c0_73 = arith.constant 0 : index
    %c0_74 = arith.constant 0 : index
    %c0_75 = arith.constant 0 : index
    %212 = vector.load %arg10[%c0_73, %c0_74, %c0_75] : memref<8x8x128xf32, #tpu.memory_space<vmem>>, vector<8x8x128xf32>
    tpu.vector_store %arg10[%c0_73, %c0_74, %c0_75], %211 {strides = array<i32>} : memref<8x8x128xf32, #tpu.memory_space<vmem>>, vector<8x8x128xf32>,
    return
  }
  func.func @transform_0(%arg0: i32, %arg1: i32) -> (i32, i32, i32) {
    %c0_i32 = arith.constant 0 : i32
    %c0_i32_0 = arith.constant 0 : i32
    return %arg1, %arg0, %c0_i32 : i32, i32, i32
  }
  func.func @transform_1(%arg0: i32, %arg1: i32) -> (i32, i32) {
    %c0_i32 = arith.constant 0 : i32
    %c0_i32_0 = arith.constant 0 : i32
    return %arg0, %c0_i32 : i32, i32
  }
  func.func @transform_2(%arg0: i32, %arg1: i32) -> (i32, i32) {
    %c0_i32 = arith.constant 0 : i32
    %c0_i32_0 = arith.constant 0 : i32
    return %arg0, %c0_i32 : i32, i32
  }
  func.func @transform_3(%arg0: i32, %arg1: i32) -> (i32, i32) {
    %c0_i32 = arith.constant 0 : i32
    %c0_i32_0 = arith.constant 0 : i32
    %c0_i32_1 = arith.constant 0 : i32
    return %c0_i32, %c0_i32_0 : i32, i32
  }
  func.func @transform_4(%arg0: i32, %arg1: i32) -> (i32, i32) {
    %c0_i32 = arith.constant 0 : i32
    %c0_i32_0 = arith.constant 0 : i32
    %c0_i32_1 = arith.constant 0 : i32
    return %c0_i32, %c0_i32_0 : i32, i32
  }
  func.func @transform_5(%arg0: i32, %arg1: i32) -> (i32, i32) {
    %c0_i32 = arith.constant 0 : i32
    %c0_i32_0 = arith.constant 0 : i32
    %c0_i32_1 = arith.constant 0 : i32
    return %c0_i32, %c0_i32_0 : i32, i32
  }
  func.func @transform_6(%arg0: i32, %arg1: i32) -> (i32, i32) {
    %c0_i32 = arith.constant 0 : i32
    %c0_i32_0 = arith.constant 0 : i32
    %c0_i32_1 = arith.constant 0 : i32
    return %c0_i32, %c0_i32_0 : i32, i32
  }
  func.func @transform_7(%arg0: i32, %arg1: i32) -> (i32, i32) {
    %c0_i32 = arith.constant 0 : i32
    %c0_i32_0 = arith.constant 0 : i32
    %c0_i32_1 = arith.constant 0 : i32
    return %c0_i32, %c0_i32_0 : i32, i32
  }
  func.func @transform_8(%arg0: i32, %arg1: i32) -> (i32, i32, i32) {
    %c0_i32 = arith.constant 0 : i32
    %c0_i32_0 = arith.constant 0 : i32
    return %arg1, %arg0, %c0_i32 : i32, i32, i32
  }
}

</mosaic_0001>

<bundles_post_ra>
// kernel: tpu_custom_call.1
= control target key start
LH: loop header
LB: loop body
LE: loop exit
PB: predicated region body
PF: predicated region fallthrough
CT: control target
= control target key end

     0   :  { %13 = vsyncpa [#allocation7], 0  ;;  %s3517_s0 = inlined_call_operand.vmem [shape: f32[8,8,4], index: 0, kind: input, shape index: {}]   ;;  %s3518_s1 = inlined_call_operand.vmem [shape: f32[8,128], index: 1, kind: input, shape index: {}]   ;;  %s3519_s2 = inlined_call_operand.vmem [shape: f32[8,128], index: 2, kind: input, shape index: {}]   ;;  %s3520_s3 = inlined_call_operand.vmem [shape: f32[4,512], index: 3, kind: input, shape index: {}]   ;;  %s3521_s4 = inlined_call_operand.vmem [shape: f32[1,512], index: 4, kind: input, shape index: {}]   ;;  %s3522_s5 = inlined_call_operand.hbm [shape: f32[128,512], index: 5, kind: input, shape index: {}]   ;;  %s3523_s6 = inlined_call_operand.hbm [shape: f32[128,128], index: 6, kind: input, shape index: {}]   ;;  %s3524_s7 = inlined_call_operand.vmem [shape: f32[1,128], index: 7, kind: input, shape index: {}]   ;;  %s3525_s8 = inlined_call_operand.hbm [shape: f32[8,8,128], index: 8, kind: output, shape index: {}]  }
   0x1   :  { %14 = vsyncpa [#allocation10], 0 }
   0x2   :  { %15 = vsyncpa [#allocation8], 0  ;;  %s2890_s27 = smov [#allocation6]   ;;  %s2818_s9 = scalar_lea.hbm %s3522_s5, 8192 }
   0x3   :  { %s31_s28 = sshll.u32 %s2890_s27, 4  ;;  %p2819_p0 = scmp.ne.s32.totalorder %s3522_s5, %s2818_s9  ;;  %s32_s28 = int_to_ptr.vmem [resolvable:$true] %s31_s28 }
   0x4   :  { %p2822_p1 = scmp.lt.u32.totalorder %s2818_s9, %s3522_s5 }
   0x6   :  { %p2824_p2 = pnand %p2822_p1, %p2819_p0 }
   0x8   :  { %2827 = shalt.err (!%p2824_p2)
}
   0x9   :  { %s2828_s14 = scalar_lea.vmem %s32_s28, 8192  ;;  %p2833_p4 = scmp.lt.s32.totalorder %s32_s28, %s32_s28 }
   0xa   :  { %p2829_p3 = scmp.ne.s32.totalorder %s32_s28, %s2828_s14  ;;  %p2834_p5 = scmp.lt.s32.totalorder %s2828_s14, %s2828_s14 }
   0xc   :  { %p2835_p6 = por %p2834_p5, %p2833_p4 }
   0xe   :  { %p2836_p7 = pnand %p2835_p6, %p2829_p3 }
  0x10   :  { %2839 = shalt.err (!%p2836_p7)
}
  0x11   :  { %s2891_s15 = smov 512   ;;  %s2892_s16 = smov 32  }
  0x12   :  { %37 = dma.hbm_to_vmem [thread:$0]  %s3522_s5, 8192, %s32_s28, [#allocation7], %s2891_s15, %s2891_s15, %s2892_s16  }
  0x13   :  { %s2893_s19 = smov [#allocation9]   ;;  %s2840_s23 = scalar_lea.hbm %s3523_s6, 2048 }
  0x14   :  { %s43_s20 = sshll.u32 %s2893_s19, 4  ;;  %p2841_p8 = scmp.ne.s32.totalorder %s3523_s6, %s2840_s23  ;;  %s44_s20 = int_to_ptr.vmem [resolvable:$true] %s43_s20 }
  0x15   :  { %p2844_p9 = scmp.lt.u32.totalorder %s2840_s23, %s3523_s6 }
  0x17   :  { %p2846_p10 = pnand %p2844_p9, %p2841_p8 }
  0x19   :  { %2849 = shalt.err (!%p2846_p10)
}
  0x1a   :  { %s2850_s29 = scalar_lea.vmem %s44_s20, 2048  ;;  %p2855_p12 = scmp.lt.s32.totalorder %s44_s20, %s44_s20 }
  0x1b   :  { %p2851_p11 = scmp.ne.s32.totalorder %s44_s20, %s2850_s29  ;;  %p2856_p13 = scmp.lt.s32.totalorder %s2850_s29, %s2850_s29 }
  0x1d   :  { %p2857_p0 = por %p2856_p13, %p2855_p12 }
  0x1f   :  { %p2858_p1 = pnand %p2857_p0, %p2851_p11 }
  0x21   :  { %2861 = shalt.err (!%p2858_p1)
}
  0x22   :  { %s2894_s5 = smov 128   ;;  %s2895_s28 = smov 8  }
  0x23   :  { %49 = dma.hbm_to_vmem [thread:$0]  %s3523_s6, 2048, %s44_s20, [#allocation10], %s2894_s5, %s2894_s5, %s2895_s28  }
  0x24   :  { %2884 = dma.done.wait [#allocation7], 8192  }
  0x25   :  { %2885 = vsyncadd [#allocation7], 4294959104 }
  0x26   :  { %2886 = dma.done.wait [#allocation10], 2048  }
  0x27   :  { %2887 = vsyncadd [#allocation10], 4294965248  ;;  %v2896_v0 = vmov 0.0   ;;  %v75_v1 = vld [vmem:[%s3520_s3 + $0x8] sm:$0xff]  ;;  %vm127_vm0 = vcmask 1043456   ;;  %v394_v5 = vld [vmem:[#allocation6] sm:$0xff] }
  0x28   :  { %313 = vmatprep.mubr.f32.mxu1 %v2896_v0  ;;  %200 = vmatprep.mubr.f32.mxu0 %v2896_v0  ;;  %v395_v2 = vld [vmem:[#allocation6 + $0x8] sm:$0xff]  ;;  %v101_v3 = vcombine.high %v75_v1, %v75_v1  ;;  %v398_v6 = vld [vmem:[#allocation6 + $0x20] sm:$0xff]  ;;  %vm102_vm1 = vcmask 31744   ;;  %v3004_v24 = vld [vmem:[%s3517_s0 + $0x10] sm:$0xff] }
  0x29   :  { %v399_v4 = vld [vmem:[#allocation6 + $0x28] sm:$0xff]  ;;  %v66_v7 = vld [vmem:[%s3517_s0] sm:$0xff]  ;;  %v2980_v9 = vpack.c.bf16 %v398_v6, %v394_v5  ;;  %v3021_v33 = vld [vmem:[%s3517_s0 + $0x18] sm:$0xff] }
  0x2a   :  { %v2978_v8 = vpack.c.bf16 %v399_v4, %v395_v2  ;;  %v403_v10 = vld [vmem:[#allocation6 + $0x48] sm:$0xff]  ;;  %2041 = vmatprep.subr.msk.mxu1 %vm127_vm0, %v101_v3  ;;  %v402_v13 = vld [vmem:[#allocation6 + $0x40] sm:$0xff]  ;;  %v72_v54 = vld [vmem:[%s3517_s0 + $0x30] sm:$0xff] }
  0x2b   :  { %v407_v11 = vld [vmem:[#allocation6 + $0x68] sm:$0xff]  ;;  %v406_v14 = vld [vmem:[#allocation6 + $0x60] sm:$0xff]  ;;  %2042 = vmatpush1.msk.msra.mxu1 %vm127_vm0, %v75_v1  ;;  %v397_v59 = vld [vmem:[#allocation6 + $0x18] sm:$0xff] }
  0x2c   :  { %v2983_v12 = vpack.c.bf16 %v407_v11, %v403_v10  ;;  %v411_v15 = vld [vmem:[#allocation6 + $0x88] sm:$0xff]  ;;  %2043 = vmatmul.mubr.msk.f32.vlgmr.msra.gmra.mrb[0].mxu1 %vm102_vm1, %v66_v7  ;;  %2121 = vmatprep.subr.bf16.mxu1 %v2978_v8  ;;  %v2993_v18 = vpack.c.bf16 %v406_v14, %v402_v13  ;;  %v410_v20 = vld [vmem:[#allocation6 + $0x80] sm:$0xff]  ;;  %v401_v60 = vld [vmem:[#allocation6 + $0x38] sm:$0xff] }
  0x2d   :  { %v415_v16 = vld [vmem:[#allocation6 + $0xa8] sm:$0xff]  ;;  %2123 = vmatpush1.bf16.msra.mxu1 %v2980_v9  ;;  %319 = vmatprep.mubr.f32.mxu1 %v2896_v0  ;;  %v414_v21 = vld [vmem:[#allocation6 + $0xa0] sm:$0xff]  ;;  %v73_v61 = vld [vmem:[%s3517_s0 + $0x38] sm:$0xff]  ;;  %v3093_v63 = vpack.c.bf16 %v401_v60, %v397_v59 }
  0x2e   :  { %v67_v17 = vld [vmem:[%s3517_s0 + $0x8] sm:$0xff]  ;;  %2125 = vmatprep.subr.bf16.mxu1 %v2983_v12  ;;  %v2996_v19 = vpack.c.bf16 %v415_v16, %v411_v15  ;;  %v3006_v25 = vpack.c.bf16 %v414_v21, %v410_v20  ;;  %v418_v27 = vld [vmem:[#allocation6 + $0xc0] sm:$0xff]  ;;  %v396_v1 = vld [vmem:[#allocation6 + $0x10] sm:$0xff] }
  0x2f   :  { %v419_v22 = vld [vmem:[#allocation6 + $0xc8] sm:$0xff]  ;;  %v422_v28 = vld [vmem:[#allocation6 + $0xe0] sm:$0xff]  ;;  %v400_v2 = vld [vmem:[#allocation6 + $0x30] sm:$0xff] }
  0x30   :  { %v423_v23 = vld [vmem:[#allocation6 + $0xe8] sm:$0xff]  ;;  %2044 = vmatmul.mubr.msk.f32.gmra.mrb[2].mxu1 %vm102_vm1, %v67_v17  ;;  %v74_v31 = vld [vmem:[%s3520_s3] sm:$0xff]  ;;  %v3023_v34 = vpack.c.bf16 %v422_v28, %v418_v27  ;;  %v405_v3 = vld [vmem:[#allocation6 + $0x58] sm:$0xff]  ;;  %v3108_v6 = vpack.c.bf16 %v400_v2, %v396_v1  ;;  %v78_v2 = vlaneseq }
  0x31   :  { %2127 = vmatpush1.bf16.msra.mxu1 %v2993_v18  ;;  %325 = vmatprep.mubr.f32.mxu1 %v2896_v0  ;;  %v3009_v26 = vpack.c.bf16 %v423_v23, %v419_v22  ;;  %v427_v29 = vld [vmem:[#allocation6 + $0x108] sm:$0xff]  ;;  %v100_v32 = vcombine.high %v74_v31, %v74_v31  ;;  %v426_v36 = vld [vmem:[#allocation6 + $0x100] sm:$0xff]  ;;  %v409_v4 = vld [vmem:[#allocation6 + $0x78] sm:$0xff] }
  0x32   :  { %2129 = vmatprep.subr.bf16.mxu1 %v2996_v19  ;;  %v431_v30 = vld [vmem:[#allocation6 + $0x128] sm:$0xff]  ;;  %v430_v37 = vld [vmem:[#allocation6 + $0x120] sm:$0xff]  ;;  %v404_v10 = vld [vmem:[#allocation6 + $0x50] sm:$0xff] }
  0x33   :  { %v3026_v35 = vpack.c.bf16 %v431_v30, %v427_v29  ;;  %2031 = vmatprep.subr.msk.mxu0 %vm127_vm0, %v100_v32  ;;  %v435_v38 = vld [vmem:[#allocation6 + $0x148] sm:$0xff]  ;;  %v3038_v40 = vld [vmem:[%s3517_s0 + $0x20] sm:$0xff]  ;;  %v3040_v41 = vpack.c.bf16 %v430_v37, %v426_v36  ;;  %v408_v11 = vld [vmem:[#allocation6 + $0x70] sm:$0xff] }
  0x34   :  { %2045 = vmatmul.mubr.msk.f32.gmra.mrb[4].mxu1 %vm102_vm1, %v3004_v24  ;;  %v439_v39 = vld [vmem:[#allocation6 + $0x168] sm:$0xff]  ;;  %2032 = vmatpush1.msk.msra.mxu0 %vm127_vm0, %v74_v31  ;;  %v434_v43 = vld [vmem:[#allocation6 + $0x140] sm:$0xff]  ;;  %v413_v13 = vld [vmem:[#allocation6 + $0x98] sm:$0xff]  ;;  %v3120_v15 = vpack.c.bf16 %v408_v11, %v404_v10 }
  0x35   :  { %2131 = vmatpush1.bf16.msra.mxu1 %v3006_v25  ;;  %331 = vmatprep.mubr.f32.mxu1 %v2896_v0  ;;  %v3043_v42 = vpack.c.bf16 %v439_v39, %v435_v38  ;;  %v438_v44 = vld [vmem:[#allocation6 + $0x160] sm:$0xff]  ;;  %v443_v45 = vld [vmem:[#allocation6 + $0x188] sm:$0xff]  ;;  %v417_v14 = vld [vmem:[#allocation6 + $0xb8] sm:$0xff] }
  0x36   :  { %2133 = vmatprep.subr.bf16.mxu1 %v3009_v26  ;;  %2033 = vmatmul.mubr.msk.f32.vlgmr.msra.gmra.mrb[0].mxu0 %vm102_vm1, %v66_v7  ;;  %v447_v46 = vld [vmem:[#allocation6 + $0x1a8] sm:$0xff]  ;;  %v3058_v48 = vpack.c.bf16 %v438_v44, %v434_v43  ;;  %v442_v50 = vld [vmem:[#allocation6 + $0x180] sm:$0xff]  ;;  %v3111_v7 = vpack.c.bf16 %v409_v4, %v405_v3  ;;  %v3124_v16 = vpack.c.bf16 %v417_v14, %v413_v13  ;;  %v416_v20 = vld [vmem:[#allocation6 + $0xb0] sm:$0xff]  ;;  %v79_v4 = vshrl.u32 %v78_v2, 7 }
  0x37   :  { %2185 = vmatprep.subr.bf16.mxu0 %v2978_v8  ;;  %206 = vmatprep.mubr.f32.mxu0 %v2896_v0  ;;  %v3056_v47 = vld [vmem:[%s3517_s0 + $0x28] sm:$0xff]  ;;  %v3061_v49 = vpack.c.bf16 %v447_v46, %v443_v45  ;;  %v446_v51 = vld [vmem:[#allocation6 + $0x1a0] sm:$0xff]  ;;  %v421_v21 = vld [vmem:[#allocation6 + $0xd8] sm:$0xff] }
  0x38   :  { %2046 = vmatmul.mubr.msk.f32.gmra.mrb[6].mxu1 %vm102_vm1, %v3021_v33  ;;  %2187 = vmatpush1.bf16.msra.mxu0 %v2980_v9  ;;  %v451_v52 = vld [vmem:[#allocation6 + $0x1c8] sm:$0xff]  ;;  %v3074_v55 = vpack.c.bf16 %v446_v51, %v442_v50  ;;  %v450_v57 = vld [vmem:[#allocation6 + $0x1c0] sm:$0xff]  ;;  %v425_v22 = vld [vmem:[#allocation6 + $0xf8] sm:$0xff]  ;;  %v84_v11 = vsub.s32 1, %v79_v4 }
  0x39   :  { %2135 = vmatpush1.bf16.msra.mxu1 %v3023_v34  ;;  %337 = vmatprep.mubr.f32.mxu1 %v2896_v0  ;;  %v455_v53 = vld [vmem:[#allocation6 + $0x1e8] sm:$0xff]  ;;  %v454_v58 = vld [vmem:[#allocation6 + $0x1e0] sm:$0xff]  ;;  %v420_v27 = vld [vmem:[#allocation6 + $0xd0] sm:$0xff] }
  0x3a   :  { %2137 = vmatprep.subr.bf16.mxu1 %v3026_v35  ;;  %2189 = vmatprep.subr.bf16.mxu0 %v2983_v12  ;;  %v3077_v56 = vpack.c.bf16 %v455_v53, %v451_v52  ;;  %v3090_v62 = vpack.c.bf16 %v454_v58, %v450_v57  ;;  %v3106_v5 = vld [vmem:[%s3518_s1] sm:$0xff]  ;;  %v424_v28 = vld [vmem:[#allocation6 + $0xf0] sm:$0xff]  ;;  %v429_v29 = vld [vmem:[#allocation6 + $0x118] sm:$0xff] }
  0x3b   :  { %2034 = vmatmul.mubr.msk.f32.gmra.mrb[2].mxu0 %vm102_vm1, %v67_v17  ;;  %v412_v17 = vld [vmem:[#allocation6 + $0x90] sm:$0xff]  ;;  %v433_v30 = vld [vmem:[#allocation6 + $0x138] sm:$0xff]  ;;  %v3142_v31 = vpack.c.bf16 %v424_v28, %v420_v27  ;;  %v76_v10 = vld [vmem:[%s3521_s4] sm:$0xf] }
  0x3c   :  { %2047 = vmatmul.mubr.msk.f32.gmra.mrb[8].mxu1 %vm102_vm1, %v3038_v40  ;;  %2191 = vmatpush1.bf16.msra.mxu0 %v2993_v18  ;;  %v3132_v23 = vpack.c.bf16 %v416_v20, %v412_v17  ;;  %v3145_v32 = vpack.c.bf16 %v433_v30, %v429_v29  ;;  %v432_v36 = vld [vmem:[#allocation6 + $0x130] sm:$0xff]  ;;  %v437_v37 = vld [vmem:[#allocation6 + $0x158] sm:$0xff]  ;;  %v3198_v14 = vrot.slane %v76_v10, %v84_v11 }
  0x3d   :  { %2139 = vmatpush1.bf16.msra.mxu1 %v3040_v41  ;;  %343 = vmatprep.mubr.f32.mxu1 %v2896_v0  ;;  %v441_v38 = vld [vmem:[#allocation6 + $0x178] sm:$0xff]  ;;  %v436_v43 = vld [vmem:[#allocation6 + $0x150] sm:$0xff] }
  0x3e   :  { %2141 = vmatprep.subr.bf16.mxu1 %v3043_v42  ;;  %212 = vmatprep.mubr.f32.mxu0 %v2896_v0  ;;  %v440_v44 = vld [vmem:[#allocation6 + $0x170] sm:$0xff]  ;;  %v445_v45 = vld [vmem:[#allocation6 + $0x198] sm:$0xff] }
  0x3f   :  { %2193 = vmatprep.subr.bf16.mxu0 %v2996_v19  ;;  %2035 = vmatmul.mubr.msk.f32.gmra.mrb[4].mxu0 %vm102_vm1, %v3004_v24  ;;  %v3135_v24 = vpack.c.bf16 %v425_v22, %v421_v21  ;;  %v449_v46 = vld [vmem:[#allocation6 + $0x1b8] sm:$0xff]  ;;  %v444_v51 = vld [vmem:[#allocation6 + $0x190] sm:$0xff] }
  0x40   :  { %2048 = vmatmul.mubr.msk.f32.gmra.mrb[10].mxu1 %vm102_vm1, %v3056_v47  ;;  %2195 = vmatpush1.bf16.msra.mxu0 %v3006_v25  ;;  %v3161_v50 = vpack.c.bf16 %v449_v46, %v445_v45  ;;  %v448_v52 = vld [vmem:[#allocation6 + $0x1b0] sm:$0xff]  ;;  %v453_v53 = vld [vmem:[#allocation6 + $0x1d8] sm:$0xff] }
  0x41   :  { %2143 = vmatpush1.bf16.msra.mxu1 %v3058_v48  ;;  %349 = vmatprep.mubr.f32.mxu1 %v2896_v0  ;;  %v3164_v57 = vpack.c.bf16 %v448_v52, %v444_v51  ;;  %v452_v59 = vld [vmem:[#allocation6 + $0x1d0] sm:$0xff] }
  0x42   :  { %2145 = vmatprep.subr.bf16.mxu1 %v3061_v49  ;;  %218 = vmatprep.mubr.f32.mxu0 %v2896_v0  ;;  %v456_v60 = vld [vmem:[#allocation6 + $0x1f0] sm:$0xff] }
  0x43   :  { %2197 = vmatprep.subr.bf16.mxu0 %v3009_v26  ;;  %2036 = vmatmul.mubr.msk.f32.gmra.mrb[6].mxu0 %vm102_vm1, %v3021_v33  ;;  %v428_v33 = vld [vmem:[#allocation6 + $0x110] sm:$0xff] }
  0x44   :  { %2049 = vmatmul.mubr.msk.f32.gmra.mrb[12].mxu1 %vm102_vm1, %v72_v54  ;;  %2199 = vmatpush1.bf16.msra.mxu0 %v3023_v34  ;;  %v3152_v39 = vpack.c.bf16 %v432_v36, %v428_v33  ;;  %v92_v33 = vsub.s32 3, %v79_v4  ;;  %v88_v36 = vsub.s32 2, %v79_v4 }
  0x45   :  { %2147 = vmatpush1.bf16.msra.mxu1 %v3074_v55  ;;  %355 = vmatprep.mubr.f32.mxu1 %v2896_v0 }
  0x46   :  { %2149 = vmatprep.subr.bf16.mxu1 %v3077_v56  ;;  %224 = vmatprep.mubr.f32.mxu0 %v2896_v0 }
  0x47   :  { %2201 = vmatprep.subr.bf16.mxu0 %v3026_v35  ;;  %2037 = vmatmul.mubr.msk.f32.gmra.mrb[8].mxu0 %vm102_vm1, %v3038_v40  ;;  %v3155_v40 = vpack.c.bf16 %v441_v38, %v437_v37  ;;  %v3202_v37 = vrot.slane %v76_v10, %v92_v33  ;;  %v3204_v38 = vrot.slane %v76_v10, %v88_v36 }
  0x48   :  { %2050 = vmatmul.mubr.msk.f32.gmra.mrb[14].mxu1 %vm102_vm1, %v73_v61  ;;  %2203 = vmatpush1.bf16.msra.mxu0 %v3040_v41 }
  0x49   :  { %2151 = vmatpush1.bf16.msra.mxu1 %v3090_v62  ;;  %545 = vmatprep.mubr.f32.mxu1 %v2896_v0 }
  0x4a   :  { %2153 = vmatprep.subr.bf16.mxu1 %v3093_v63  ;;  %230 = vmatprep.mubr.f32.mxu0 %v2896_v0 }
  0x4b   :  { %2205 = vmatprep.subr.bf16.mxu0 %v3043_v42  ;;  %2038 = vmatmul.mubr.msk.f32.gmra.mrb[10].mxu0 %vm102_vm1, %v3056_v47  ;;  %v3158_v47 = vpack.c.bf16 %v440_v44, %v436_v43 }
  0x4c   :  { %546 = vmatmul.mubr.f32.vlgmr.msra.gmra.mrb[16].mxu1 %v3106_v5  ;;  %2207 = vmatpush1.bf16.msra.mxu0 %v3058_v48 }
  0x4d   :  { %2155 = vmatpush1.bf16.msra.mxu1 %v3108_v6  ;;  %616 = vmatprep.mubr.f32.mxu1 %v2896_v0 }
  0x4e   :  { %2157 = vmatprep.subr.bf16.mxu1 %v3111_v7  ;;  %236 = vmatprep.mubr.f32.mxu0 %v2896_v0 }
  0x4f   :  { %2209 = vmatprep.subr.bf16.mxu0 %v3061_v49  ;;  %2039 = vmatmul.mubr.msk.f32.gmra.mrb[12].mxu0 %vm102_vm1, %v72_v54  ;;  %v457_v54 = vld [vmem:[#allocation6 + $0x1f8] sm:$0xff] }
  0x50   :  { %2211 = vmatpush1.bf16.msra.mxu0 %v3074_v55  ;;  %242 = vmatprep.mubr.f32.mxu0 %v2896_v0  ;;  %v3167_v58 = vpack.c.bf16 %v457_v54, %v453_v53 }
  0x51   :  { %2159 = vmatpush1.bf16.msra.mxu1 %v3120_v15  ;;  %2213 = vmatprep.subr.bf16.mxu0 %v3077_v56 }
  0x52   :  { %2161 = vmatprep.subr.bf16.mxu1 %v3124_v16 }
  0x53   :  { %2040 = vmatmul.mubr.msk.f32.gmra.mrb[14].mxu0 %vm102_vm1, %v73_v61  ;;  %v3170_v61 = vpack.c.bf16 %v456_v60, %v452_v59 }
  0x54   :  { %2215 = vmatpush1.bf16.msra.mxu0 %v3090_v62  ;;  %718 = vmatprep.mubr.f32.mxu0 %v2896_v0 }
  0x55   :  { %2163 = vmatpush1.bf16.msra.mxu1 %v3132_v23  ;;  %2249 = vmatprep.subr.bf16.mxu0 %v2978_v8 }
  0x56   :  { %2165 = vmatprep.subr.bf16.mxu1 %v3135_v24 }
  0x59   :  { %2167 = vmatpush1.bf16.msra.mxu1 %v3142_v31 }
  0x5a   :  { %2169 = vmatprep.subr.bf16.mxu1 %v3145_v32 }
  0x5d   :  { %2171 = vmatpush1.bf16.msra.mxu1 %v3152_v39 }
  0x5e   :  { %2173 = vmatprep.subr.bf16.mxu1 %v3155_v40 }
  0x61   :  { %2175 = vmatpush1.bf16.msra.mxu1 %v3158_v47 }
  0x62   :  { %2177 = vmatprep.subr.bf16.mxu1 %v3161_v50 }
  0x65   :  { %2179 = vmatpush1.bf16.msra.mxu1 %v3164_v57 }
  0x66   :  { %2181 = vmatprep.subr.bf16.mxu1 %v3167_v58 }
  0x69   :  { %2183 = vmatpush1.bf16.msra.mxu1 %v3170_v61 }
  0x6a   :  { %2217 = vmatprep.subr.bf16.mxu1 %v3093_v63 }
  0x6c   :  { %617 = vmatmul.mubr.f32.vlgmr.msra.gmra.mrb[0].mxu1 %v3106_v5  ;;  %v80_v5 = vsub.s32 0, %v79_v4 }
  0x6d   :  { %2219 = vmatpush1.bf16.msra.mxu1 %v3108_v6  ;;  %789 = vmatprep.mubr.f32.mxu1 %v2896_v0 }
  0x6e   :  { %2221 = vmatprep.subr.bf16.mxu1 %v3111_v7  ;;  %v3196_v13 = vrot.slane %v76_v10, %v80_v5 }
  0x71   :  { %2223 = vmatpush1.bf16.msra.mxu1 %v3120_v15 }
  0x72   :  { %2225 = vmatprep.subr.bf16.mxu1 %v3124_v16 }
  0x75   :  { %2227 = vmatpush1.bf16.msra.mxu1 %v3132_v23 }
  0x76   :  { %2229 = vmatprep.subr.bf16.mxu1 %v3135_v24 }
  0x79   :  { %2231 = vmatpush1.bf16.msra.mxu1 %v3142_v31 }
  0x7a   :  { %2233 = vmatprep.subr.bf16.mxu1 %v3145_v32 }
  0x7d   :  { %2235 = vmatpush1.bf16.msra.mxu1 %v3152_v39 }
  0x7e   :  { %2237 = vmatprep.subr.bf16.mxu1 %v3155_v40 }
  0x81   :  { %2239 = vmatpush1.bf16.msra.mxu1 %v3158_v47 }
  0x82   :  { %2241 = vmatprep.subr.bf16.mxu1 %v3161_v50 }
  0x85   :  { %2243 = vmatpush1.bf16.msra.mxu1 %v3164_v57 }
  0x86   :  { %2245 = vmatprep.subr.bf16.mxu1 %v3167_v58 }
  0x89   :  { %2247 = vmatpush1.bf16.msra.mxu1 %v3170_v61 }
  0x8a   :  { %2281 = vmatprep.subr.bf16.mxu1 %v3093_v63 }
 0x109   :  { %v202_v1 = vpop.f32.mrb[0].mxu0 }
 0x10a   :  { %v204_v3 = vpop.f32.mrb[1].mxu0  ;;  %v203_v17 = vadd.f32 %v202_v1, %v3196_v13  ;;  %v64_v1 = vld [vmem:[%s3519_s2] sm:$0xff] }
 0x10b   :  { %v205_v20 = vadd.f32 %v204_v3, %v3198_v14 }
 0x11f   :  { %v547_v21 = vpop.f32.mrb[16].mxu1 }
 0x120   :  { %v623_v22 = vadd.f32 %v547_v21, %v203_v17  ;;  %v549_v27 = vpop.f32.mrb[17].mxu1 }
 0x121   :  { %v624_v28 = vadd.f32 %v549_v27, %v205_v20 }
 0x122   :  { %v627_v29 = vmul.f32 0.5, %v623_v22 }
 0x123   :  { %v628_v30 = vmul.f32 0.5, %v624_v28 }
 0x124   :  { %2738 = vtanh.f32 %v627_v29 }
 0x125   :  { %2740 = vtanh.f32 %v628_v30 }
 0x12e   :  { %v2739_v51 = vpop.eup %2738 }
 0x12f   :  { %v2741_v52 = vpop.eup %2740  ;;  %v635_v53 = vmul.f32 0.5, %v2739_v51 }
 0x130   :  { %v636_v59 = vmul.f32 0.5, %v2741_v52 }
 0x131   :  { %v639_v60 = vadd.f32 0.5, %v635_v53 }
 0x132   :  { %v640_v2 = vadd.f32 0.5, %v636_v59 }
 0x133   :  { %v643_v4 = vmul.f32 %v639_v60, %v64_v1 }
 0x13f   :  { %v618_v43 = vpop.f32.mrb[0].mxu1 }
 0x140   :  { %v620_v44 = vpop.f32.mrb[1].mxu1  ;;  %v2682_v46 = vadd.f32 %v618_v43, %v3204_v38 }
 0x141   :  { %v2683_v45 = vadd.f32 %v620_v44, %v3202_v37 }
 0x142   :  { %v629_v54 = vmul.f32 0.5, %v2682_v46 }
 0x143   :  { %2742 = vtanh.f32 %v2683_v45 }
 0x144   :  { %2744 = vtanh.f32 %v629_v54 }
 0x14d   :  { %v2743_v3 = vpop.eup %2742 }
 0x14e   :  { %v644_v5 = vmul.f32 %v2743_v3, %v640_v2  ;;  %v2745_v11 = vpop.eup %2744 }
 0x14f   :  { %v637_v17 = vmul.f32 0.5, %v2745_v11 }
 0x150   :  { %v3211_v10 = vadd.f32 %v644_v5, %v643_v4 }
 0x151   :  { %v641_v20 = vadd.f32 0.5, %v637_v17 }
 0x152   :  { %2746 = vtanh.f32 %v3211_v10 }
 0x15c   :  { %v2747_v21 = vpop.eup %2746 }
 0x15d   :  { %v3214_v22 = vmul.f32 %v2747_v21, %v641_v20 }
 0x15f   :  { %719 = vmatmul.mubr.f32.vlgmr.msra.gmra.mrb[2].mxu0 %v3214_v22  ;;  %790 = vmatmul.mubr.f32.vlgmr.msra.gmra.mrb[2].mxu1 %v3214_v22 }
 0x160   :  { %2251 = vmatpush1.bf16.msra.mxu0 %v2980_v9  ;;  %2283 = vmatpush1.bf16.msra.mxu1 %v3108_v6 }
 0x161   :  { %2253 = vmatprep.subr.bf16.mxu0 %v2983_v12  ;;  %2285 = vmatprep.subr.bf16.mxu1 %v3111_v7 }
 0x162   :  { %892 = vmatprep.mubr.f32.mxu0 %v2896_v0  ;;  %963 = vmatprep.mubr.f32.mxu1 %v2896_v0 }
 0x164   :  { %2255 = vmatpush1.bf16.msra.mxu0 %v2993_v18  ;;  %2287 = vmatpush1.bf16.msra.mxu1 %v3120_v15 }
 0x165   :  { %2257 = vmatprep.subr.bf16.mxu0 %v2996_v19  ;;  %2289 = vmatprep.subr.bf16.mxu1 %v3124_v16 }
 0x168   :  { %2259 = vmatpush1.bf16.msra.mxu0 %v3006_v25  ;;  %2291 = vmatpush1.bf16.msra.mxu1 %v3132_v23 }
 0x169   :  { %2261 = vmatprep.subr.bf16.mxu0 %v3009_v26  ;;  %2293 = vmatprep.subr.bf16.mxu1 %v3135_v24 }
 0x16c   :  { %2263 = vmatpush1.bf16.msra.mxu0 %v3023_v34  ;;  %2295 = vmatpush1.bf16.msra.mxu1 %v3142_v31 }
 0x16d   :  { %2265 = vmatprep.subr.bf16.mxu0 %v3026_v35  ;;  %2297 = vmatprep.subr.bf16.mxu1 %v3145_v32 }
 0x170   :  { %2267 = vmatpush1.bf16.msra.mxu0 %v3040_v41  ;;  %2299 = vmatpush1.bf16.msra.mxu1 %v3152_v39 }
 0x171   :  { %2269 = vmatprep.subr.bf16.mxu0 %v3043_v42  ;;  %2301 = vmatprep.subr.bf16.mxu1 %v3155_v40 }
 0x174   :  { %2271 = vmatpush1.bf16.msra.mxu0 %v3058_v48  ;;  %2303 = vmatpush1.bf16.msra.mxu1 %v3158_v47 }
 0x175   :  { %2273 = vmatprep.subr.bf16.mxu0 %v3061_v49  ;;  %2305 = vmatprep.subr.bf16.mxu1 %v3161_v50 }
 0x178   :  { %2275 = vmatpush1.bf16.msra.mxu0 %v3074_v55  ;;  %2307 = vmatpush1.bf16.msra.mxu1 %v3164_v57 }
 0x179   :  { %2277 = vmatprep.subr.bf16.mxu0 %v3077_v56  ;;  %2309 = vmatprep.subr.bf16.mxu1 %v3167_v58 }
 0x17c   :  { %2279 = vmatpush1.bf16.msra.mxu0 %v3090_v62  ;;  %2311 = vmatpush1.bf16.msra.mxu1 %v3170_v61 }
 0x17d   :  { %2313 = vmatprep.subr.bf16.mxu0 %v2978_v8  ;;  %2345 = vmatprep.subr.bf16.mxu1 %v3093_v63 }
 0x232   :  { %v720_v27 = vpop.f32.mrb[2].mxu0  ;;  %v791_v28 = vpop.f32.mrb[2].mxu1 }
 0x233   :  { %v2668_v29 = vadd.f32 %v720_v27, %v3196_v13  ;;  %v722_v30 = vpop.f32.mrb[3].mxu0  ;;  %v793_v33 = vpop.f32.mrb[3].mxu1  ;;  %v2684_v46 = vadd.f32 %v791_v28, %v3204_v38 }
 0x234   :  { %v2669_v36 = vadd.f32 %v722_v30, %v3198_v14  ;;  %v2685_v45 = vadd.f32 %v793_v33, %v3202_v37 }
 0x235   :  { %v800_v43 = vmul.f32 0.5, %v2668_v29  ;;  %v802_v51 = vmul.f32 0.5, %v2684_v46 }
 0x236   :  { %v801_v44 = vmul.f32 0.5, %v2669_v36 }
 0x237   :  { %2748 = vtanh.f32 %v800_v43 }
 0x238   :  { %2750 = vtanh.f32 %v801_v44 }
 0x239   :  { %2752 = vtanh.f32 %v2685_v45 }
 0x23a   :  { %2754 = vtanh.f32 %v802_v51 }
 0x241   :  { %v2749_v52 = vpop.eup %2748 }
 0x242   :  { %v808_v53 = vmul.f32 0.5, %v2749_v52  ;;  %v2751_v54 = vpop.eup %2750 }
 0x243   :  { %v809_v60 = vmul.f32 0.5, %v2751_v54  ;;  %v2753_v3 = vpop.eup %2752 }
 0x244   :  { %v812_v59 = vadd.f32 0.5, %v808_v53  ;;  %v2755_v11 = vpop.eup %2754 }
 0x245   :  { %v813_v2 = vadd.f32 0.5, %v809_v60  ;;  %v810_v17 = vmul.f32 0.5, %v2755_v11 }
 0x246   :  { %v816_v1 = vmul.f32 %v812_v59, %v3211_v10 }
 0x247   :  { %v817_v4 = vmul.f32 %v2753_v3, %v813_v2  ;;  %v814_v20 = vadd.f32 0.5, %v810_v17 }
 0x249   :  { %v3257_v5 = vadd.f32 %v817_v4, %v816_v1 }
 0x24b   :  { %2756 = vtanh.f32 %v3257_v5 }
 0x255   :  { %v2757_v21 = vpop.eup %2756 }
 0x256   :  { %v3260_v27 = vmul.f32 %v2757_v21, %v814_v20 }
 0x258   :  { %893 = vmatmul.mubr.f32.vlgmr.msra.gmra.mrb[4].mxu0 %v3260_v27  ;;  %964 = vmatmul.mubr.f32.vlgmr.msra.gmra.mrb[4].mxu1 %v3260_v27 }
 0x259   :  { %2315 = vmatpush1.bf16.msra.mxu0 %v2980_v9  ;;  %2347 = vmatpush1.bf16.msra.mxu1 %v3108_v6 }
 0x25a   :  { %2317 = vmatprep.subr.bf16.mxu0 %v2983_v12  ;;  %2349 = vmatprep.subr.bf16.mxu1 %v3111_v7 }
 0x25b   :  { %1066 = vmatprep.mubr.f32.mxu0 %v2896_v0  ;;  %1137 = vmatprep.mubr.f32.mxu1 %v2896_v0 }
 0x25d   :  { %2319 = vmatpush1.bf16.msra.mxu0 %v2993_v18  ;;  %2351 = vmatpush1.bf16.msra.mxu1 %v3120_v15 }
 0x25e   :  { %2321 = vmatprep.subr.bf16.mxu0 %v2996_v19  ;;  %2353 = vmatprep.subr.bf16.mxu1 %v3124_v16 }
 0x261   :  { %2323 = vmatpush1.bf16.msra.mxu0 %v3006_v25  ;;  %2355 = vmatpush1.bf16.msra.mxu1 %v3132_v23 }
 0x262   :  { %2325 = vmatprep.subr.bf16.mxu0 %v3009_v26  ;;  %2357 = vmatprep.subr.bf16.mxu1 %v3135_v24 }
 0x265   :  { %2327 = vmatpush1.bf16.msra.mxu0 %v3023_v34  ;;  %2359 = vmatpush1.bf16.msra.mxu1 %v3142_v31 }
 0x266   :  { %2329 = vmatprep.subr.bf16.mxu0 %v3026_v35  ;;  %2361 = vmatprep.subr.bf16.mxu1 %v3145_v32 }
 0x269   :  { %2331 = vmatpush1.bf16.msra.mxu0 %v3040_v41  ;;  %2363 = vmatpush1.bf16.msra.mxu1 %v3152_v39 }
 0x26a   :  { %2333 = vmatprep.subr.bf16.mxu0 %v3043_v42  ;;  %2365 = vmatprep.subr.bf16.mxu1 %v3155_v40 }
 0x26d   :  { %2335 = vmatpush1.bf16.msra.mxu0 %v3058_v48  ;;  %2367 = vmatpush1.bf16.msra.mxu1 %v3158_v47 }
 0x26e   :  { %2337 = vmatprep.subr.bf16.mxu0 %v3061_v49  ;;  %2369 = vmatprep.subr.bf16.mxu1 %v3161_v50 }
 0x271   :  { %2339 = vmatpush1.bf16.msra.mxu0 %v3074_v55  ;;  %2371 = vmatpush1.bf16.msra.mxu1 %v3164_v57 }
 0x272   :  { %2341 = vmatprep.subr.bf16.mxu0 %v3077_v56  ;;  %2373 = vmatprep.subr.bf16.mxu1 %v3167_v58 }
 0x275   :  { %2343 = vmatpush1.bf16.msra.mxu0 %v3090_v62  ;;  %2375 = vmatpush1.bf16.msra.mxu1 %v3170_v61 }
 0x276   :  { %2377 = vmatprep.subr.bf16.mxu0 %v2978_v8  ;;  %2409 = vmatprep.subr.bf16.mxu1 %v3093_v63 }
 0x32b   :  { %v894_v10 = vpop.f32.mrb[4].mxu0  ;;  %v965_v28 = vpop.f32.mrb[4].mxu1 }
 0x32c   :  { %v2670_v29 = vadd.f32 %v894_v10, %v3196_v13  ;;  %v896_v30 = vpop.f32.mrb[5].mxu0  ;;  %v967_v33 = vpop.f32.mrb[5].mxu1  ;;  %v2686_v46 = vadd.f32 %v965_v28, %v3204_v38 }
 0x32d   :  { %v2671_v36 = vadd.f32 %v896_v30, %v3198_v14  ;;  %v2687_v45 = vadd.f32 %v967_v33, %v3202_v37 }
 0x32e   :  { %v974_v43 = vmul.f32 0.5, %v2670_v29  ;;  %v976_v51 = vmul.f32 0.5, %v2686_v46 }
 0x32f   :  { %v975_v44 = vmul.f32 0.5, %v2671_v36 }
 0x330   :  { %2758 = vtanh.f32 %v974_v43 }
 0x331   :  { %2760 = vtanh.f32 %v975_v44 }
 0x332   :  { %2762 = vtanh.f32 %v2687_v45 }
 0x333   :  { %2764 = vtanh.f32 %v976_v51 }
 0x33a   :  { %v2759_v52 = vpop.eup %2758 }
 0x33b   :  { %v982_v53 = vmul.f32 0.5, %v2759_v52  ;;  %v2761_v54 = vpop.eup %2760 }
 0x33c   :  { %v983_v60 = vmul.f32 0.5, %v2761_v54  ;;  %v2763_v3 = vpop.eup %2762 }
 0x33d   :  { %v986_v59 = vadd.f32 0.5, %v982_v53  ;;  %v2765_v17 = vpop.eup %2764 }
 0x33e   :  { %v987_v2 = vadd.f32 0.5, %v983_v60  ;;  %v984_v20 = vmul.f32 0.5, %v2765_v17 }
 0x33f   :  { %v990_v1 = vmul.f32 %v986_v59, %v3257_v5 }
 0x340   :  { %v991_v4 = vmul.f32 %v2763_v3, %v987_v2  ;;  %v988_v21 = vadd.f32 0.5, %v984_v20 }
 0x342   :  { %v3303_v11 = vadd.f32 %v991_v4, %v990_v1 }
 0x344   :  { %2766 = vtanh.f32 %v3303_v11 }
 0x34e   :  { %v2767_v10 = vpop.eup %2766 }
 0x34f   :  { %v3306_v28 = vmul.f32 %v2767_v10, %v988_v21 }
 0x351   :  { %1067 = vmatmul.mubr.f32.vlgmr.msra.gmra.mrb[6].mxu0 %v3306_v28  ;;  %1138 = vmatmul.mubr.f32.vlgmr.msra.gmra.mrb[6].mxu1 %v3306_v28 }
 0x352   :  { %2379 = vmatpush1.bf16.msra.mxu0 %v2980_v9  ;;  %2411 = vmatpush1.bf16.msra.mxu1 %v3108_v6 }
 0x353   :  { %2381 = vmatprep.subr.bf16.mxu0 %v2983_v12  ;;  %2413 = vmatprep.subr.bf16.mxu1 %v3111_v7 }
 0x354   :  { %1240 = vmatprep.mubr.f32.mxu0 %v2896_v0  ;;  %1311 = vmatprep.mubr.f32.mxu1 %v2896_v0 }
 0x356   :  { %2383 = vmatpush1.bf16.msra.mxu0 %v2993_v18  ;;  %2415 = vmatpush1.bf16.msra.mxu1 %v3120_v15 }
 0x357   :  { %2385 = vmatprep.subr.bf16.mxu0 %v2996_v19  ;;  %2417 = vmatprep.subr.bf16.mxu1 %v3124_v16 }
 0x35a   :  { %2387 = vmatpush1.bf16.msra.mxu0 %v3006_v25  ;;  %2419 = vmatpush1.bf16.msra.mxu1 %v3132_v23 }
 0x35b   :  { %2389 = vmatprep.subr.bf16.mxu0 %v3009_v26  ;;  %2421 = vmatprep.subr.bf16.mxu1 %v3135_v24 }
 0x35e   :  { %2391 = vmatpush1.bf16.msra.mxu0 %v3023_v34  ;;  %2423 = vmatpush1.bf16.msra.mxu1 %v3142_v31 }
 0x35f   :  { %2393 = vmatprep.subr.bf16.mxu0 %v3026_v35  ;;  %2425 = vmatprep.subr.bf16.mxu1 %v3145_v32 }
 0x362   :  { %2395 = vmatpush1.bf16.msra.mxu0 %v3040_v41  ;;  %2427 = vmatpush1.bf16.msra.mxu1 %v3152_v39 }
 0x363   :  { %2397 = vmatprep.subr.bf16.mxu0 %v3043_v42  ;;  %2429 = vmatprep.subr.bf16.mxu1 %v3155_v40 }
 0x366   :  { %2399 = vmatpush1.bf16.msra.mxu0 %v3058_v48  ;;  %2431 = vmatpush1.bf16.msra.mxu1 %v3158_v47 }
 0x367   :  { %2401 = vmatprep.subr.bf16.mxu0 %v3061_v49  ;;  %2433 = vmatprep.subr.bf16.mxu1 %v3161_v50 }
 0x36a   :  { %2403 = vmatpush1.bf16.msra.mxu0 %v3074_v55  ;;  %2435 = vmatpush1.bf16.msra.mxu1 %v3164_v57 }
 0x36b   :  { %2405 = vmatprep.subr.bf16.mxu0 %v3077_v56  ;;  %2437 = vmatprep.subr.bf16.mxu1 %v3167_v58 }
 0x36e   :  { %2407 = vmatpush1.bf16.msra.mxu0 %v3090_v62  ;;  %2439 = vmatpush1.bf16.msra.mxu1 %v3170_v61 }
 0x36f   :  { %2441 = vmatprep.subr.bf16.mxu0 %v2978_v8  ;;  %2473 = vmatprep.subr.bf16.mxu1 %v3093_v63 }
 0x424   :  { %v1068_v5 = vpop.f32.mrb[6].mxu0  ;;  %v1139_v29 = vpop.f32.mrb[6].mxu1 }
 0x425   :  { %v2672_v30 = vadd.f32 %v1068_v5, %v3196_v13  ;;  %v1070_v33 = vpop.f32.mrb[7].mxu0  ;;  %v1141_v36 = vpop.f32.mrb[7].mxu1  ;;  %v2688_v51 = vadd.f32 %v1139_v29, %v3204_v38 }
 0x426   :  { %v2673_v43 = vadd.f32 %v1070_v33, %v3198_v14  ;;  %v2689_v46 = vadd.f32 %v1141_v36, %v3202_v37 }
 0x427   :  { %v1148_v44 = vmul.f32 0.5, %v2672_v30  ;;  %v1150_v52 = vmul.f32 0.5, %v2688_v51 }
 0x428   :  { %v1149_v45 = vmul.f32 0.5, %v2673_v43 }
 0x429   :  { %2768 = vtanh.f32 %v1148_v44 }
 0x42a   :  { %2770 = vtanh.f32 %v1149_v45 }
 0x42b   :  { %2772 = vtanh.f32 %v2689_v46 }
 0x42c   :  { %2774 = vtanh.f32 %v1150_v52 }
 0x433   :  { %v2769_v53 = vpop.eup %2768 }
 0x434   :  { %v1156_v54 = vmul.f32 0.5, %v2769_v53  ;;  %v2771_v59 = vpop.eup %2770 }
 0x435   :  { %v1157_v1 = vmul.f32 0.5, %v2771_v59  ;;  %v2773_v4 = vpop.eup %2772 }
 0x436   :  { %v1160_v60 = vadd.f32 0.5, %v1156_v54  ;;  %v2775_v21 = vpop.eup %2774 }
 0x437   :  { %v1161_v3 = vadd.f32 0.5, %v1157_v1  ;;  %v1158_v10 = vmul.f32 0.5, %v2775_v21 }
 0x438   :  { %v1164_v2 = vmul.f32 %v1160_v60, %v3303_v11 }
 0x439   :  { %v1165_v17 = vmul.f32 %v2773_v4, %v1161_v3  ;;  %v1162_v5 = vadd.f32 0.5, %v1158_v10 }
 0x43b   :  { %v3349_v20 = vadd.f32 %v1165_v17, %v1164_v2 }
 0x43d   :  { %2776 = vtanh.f32 %v3349_v20 }
 0x447   :  { %v2777_v29 = vpop.eup %2776 }
 0x448   :  { %v3352_v30 = vmul.f32 %v2777_v29, %v1162_v5 }
 0x44a   :  { %1241 = vmatmul.mubr.f32.vlgmr.msra.gmra.mrb[8].mxu0 %v3352_v30  ;;  %1312 = vmatmul.mubr.f32.vlgmr.msra.gmra.mrb[8].mxu1 %v3352_v30 }
 0x44b   :  { %2443 = vmatpush1.bf16.msra.mxu0 %v2980_v9  ;;  %2475 = vmatpush1.bf16.msra.mxu1 %v3108_v6 }
 0x44c   :  { %2445 = vmatprep.subr.bf16.mxu0 %v2983_v12  ;;  %2477 = vmatprep.subr.bf16.mxu1 %v3111_v7 }
 0x44d   :  { %1414 = vmatprep.mubr.f32.mxu0 %v2896_v0  ;;  %1485 = vmatprep.mubr.f32.mxu1 %v2896_v0 }
 0x44f   :  { %2447 = vmatpush1.bf16.msra.mxu0 %v2993_v18  ;;  %2479 = vmatpush1.bf16.msra.mxu1 %v3120_v15 }
 0x450   :  { %2449 = vmatprep.subr.bf16.mxu0 %v2996_v19  ;;  %2481 = vmatprep.subr.bf16.mxu1 %v3124_v16 }
 0x453   :  { %2451 = vmatpush1.bf16.msra.mxu0 %v3006_v25  ;;  %2483 = vmatpush1.bf16.msra.mxu1 %v3132_v23 }
 0x454   :  { %2453 = vmatprep.subr.bf16.mxu0 %v3009_v26  ;;  %2485 = vmatprep.subr.bf16.mxu1 %v3135_v24 }
 0x457   :  { %2455 = vmatpush1.bf16.msra.mxu0 %v3023_v34  ;;  %2487 = vmatpush1.bf16.msra.mxu1 %v3142_v31 }
 0x458   :  { %2457 = vmatprep.subr.bf16.mxu0 %v3026_v35  ;;  %2489 = vmatprep.subr.bf16.mxu1 %v3145_v32 }
 0x45b   :  { %2459 = vmatpush1.bf16.msra.mxu0 %v3040_v41  ;;  %2491 = vmatpush1.bf16.msra.mxu1 %v3152_v39 }
 0x45c   :  { %2461 = vmatprep.subr.bf16.mxu0 %v3043_v42  ;;  %2493 = vmatprep.subr.bf16.mxu1 %v3155_v40 }
 0x45f   :  { %2463 = vmatpush1.bf16.msra.mxu0 %v3058_v48  ;;  %2495 = vmatpush1.bf16.msra.mxu1 %v3158_v47 }
 0x460   :  { %2465 = vmatprep.subr.bf16.mxu0 %v3061_v49  ;;  %2497 = vmatprep.subr.bf16.mxu1 %v3161_v50 }
 0x463   :  { %2467 = vmatpush1.bf16.msra.mxu0 %v3074_v55  ;;  %2499 = vmatpush1.bf16.msra.mxu1 %v3164_v57 }
 0x464   :  { %2469 = vmatprep.subr.bf16.mxu0 %v3077_v56  ;;  %2501 = vmatprep.subr.bf16.mxu1 %v3167_v58 }
 0x467   :  { %2471 = vmatpush1.bf16.msra.mxu0 %v3090_v62  ;;  %2503 = vmatpush1.bf16.msra.mxu1 %v3170_v61 }
 0x468   :  { %2505 = vmatprep.subr.bf16.mxu0 %v2978_v8  ;;  %2537 = vmatprep.subr.bf16.mxu1 %v3093_v63 }
 0x51d   :  { %v1242_v11 = vpop.f32.mrb[8].mxu0  ;;  %v1313_v33 = vpop.f32.mrb[8].mxu1 }
 0x51e   :  { %v2674_v36 = vadd.f32 %v1242_v11, %v3196_v13  ;;  %v1244_v43 = vpop.f32.mrb[9].mxu0  ;;  %v1315_v44 = vpop.f32.mrb[9].mxu1  ;;  %v2690_v53 = vadd.f32 %v1313_v33, %v3204_v38 }
 0x51f   :  { %v2675_v45 = vadd.f32 %v1244_v43, %v3198_v14  ;;  %v2691_v52 = vadd.f32 %v1315_v44, %v3202_v37 }
 0x520   :  { %v1322_v46 = vmul.f32 0.5, %v2674_v36  ;;  %v1324_v54 = vmul.f32 0.5, %v2690_v53 }
 0x521   :  { %v1323_v51 = vmul.f32 0.5, %v2675_v45 }
 0x522   :  { %2778 = vtanh.f32 %v1322_v46 }
 0x523   :  { %2780 = vtanh.f32 %v1323_v51 }
 0x524   :  { %2782 = vtanh.f32 %v2691_v52 }
 0x525   :  { %2784 = vtanh.f32 %v1324_v54 }
 0x52c   :  { %v2779_v59 = vpop.eup %2778 }
 0x52d   :  { %v1330_v60 = vmul.f32 0.5, %v2779_v59  ;;  %v2781_v1 = vpop.eup %2780 }
 0x52e   :  { %v1331_v3 = vmul.f32 0.5, %v2781_v1  ;;  %v2783_v21 = vpop.eup %2782 }
 0x52f   :  { %v1334_v2 = vadd.f32 0.5, %v1330_v60  ;;  %v2785_v29 = vpop.eup %2784 }
 0x530   :  { %v1335_v17 = vadd.f32 0.5, %v1331_v3  ;;  %v1332_v11 = vmul.f32 0.5, %v2785_v29 }
 0x531   :  { %v1338_v4 = vmul.f32 %v1334_v2, %v3349_v20 }
 0x532   :  { %v1339_v10 = vmul.f32 %v2783_v21, %v1335_v17  ;;  %v1336_v33 = vadd.f32 0.5, %v1332_v11 }
 0x534   :  { %v3395_v5 = vadd.f32 %v1339_v10, %v1338_v4 }
 0x536   :  { %2786 = vtanh.f32 %v3395_v5 }
 0x540   :  { %v2787_v36 = vpop.eup %2786 }
 0x541   :  { %v3398_v43 = vmul.f32 %v2787_v36, %v1336_v33 }
 0x543   :  { %1415 = vmatmul.mubr.f32.vlgmr.msra.gmra.mrb[10].mxu0 %v3398_v43  ;;  %1486 = vmatmul.mubr.f32.vlgmr.msra.gmra.mrb[10].mxu1 %v3398_v43 }
 0x544   :  { %2507 = vmatpush1.bf16.msra.mxu0 %v2980_v9  ;;  %2539 = vmatpush1.bf16.msra.mxu1 %v3108_v6 }
 0x545   :  { %2509 = vmatprep.subr.bf16.mxu0 %v2983_v12  ;;  %2541 = vmatprep.subr.bf16.mxu1 %v3111_v7 }
 0x546   :  { %1588 = vmatprep.mubr.f32.mxu0 %v2896_v0  ;;  %1659 = vmatprep.mubr.f32.mxu1 %v2896_v0 }
 0x548   :  { %2511 = vmatpush1.bf16.msra.mxu0 %v2993_v18  ;;  %2543 = vmatpush1.bf16.msra.mxu1 %v3120_v15 }
 0x549   :  { %2513 = vmatprep.subr.bf16.mxu0 %v2996_v19  ;;  %2545 = vmatprep.subr.bf16.mxu1 %v3124_v16 }
 0x54c   :  { %2515 = vmatpush1.bf16.msra.mxu0 %v3006_v25  ;;  %2547 = vmatpush1.bf16.msra.mxu1 %v3132_v23 }
 0x54d   :  { %2517 = vmatprep.subr.bf16.mxu0 %v3009_v26  ;;  %2549 = vmatprep.subr.bf16.mxu1 %v3135_v24 }
 0x550   :  { %2519 = vmatpush1.bf16.msra.mxu0 %v3023_v34  ;;  %2551 = vmatpush1.bf16.msra.mxu1 %v3142_v31 }
 0x551   :  { %2521 = vmatprep.subr.bf16.mxu0 %v3026_v35  ;;  %2553 = vmatprep.subr.bf16.mxu1 %v3145_v32 }
 0x554   :  { %2523 = vmatpush1.bf16.msra.mxu0 %v3040_v41  ;;  %2555 = vmatpush1.bf16.msra.mxu1 %v3152_v39 }
 0x555   :  { %2525 = vmatprep.subr.bf16.mxu0 %v3043_v42  ;;  %2557 = vmatprep.subr.bf16.mxu1 %v3155_v40 }
 0x558   :  { %2527 = vmatpush1.bf16.msra.mxu0 %v3058_v48  ;;  %2559 = vmatpush1.bf16.msra.mxu1 %v3158_v47 }
 0x559   :  { %2529 = vmatprep.subr.bf16.mxu0 %v3061_v49  ;;  %2561 = vmatprep.subr.bf16.mxu1 %v3161_v50 }
 0x55c   :  { %2531 = vmatpush1.bf16.msra.mxu0 %v3074_v55  ;;  %2563 = vmatpush1.bf16.msra.mxu1 %v3164_v57 }
 0x55d   :  { %2533 = vmatprep.subr.bf16.mxu0 %v3077_v56  ;;  %2565 = vmatprep.subr.bf16.mxu1 %v3167_v58 }
 0x560   :  { %2535 = vmatpush1.bf16.msra.mxu0 %v3090_v62  ;;  %2567 = vmatpush1.bf16.msra.mxu1 %v3170_v61 }
 0x561   :  { %2569 = vmatprep.subr.bf16.mxu0 %v2978_v8  ;;  %2601 = vmatprep.subr.bf16.mxu1 %v3093_v63 }
 0x616   :  { %v1416_v20 = vpop.f32.mrb[10].mxu0  ;;  %v1487_v44 = vpop.f32.mrb[10].mxu1 }
 0x617   :  { %v2676_v45 = vadd.f32 %v1416_v20, %v3196_v13  ;;  %v1418_v46 = vpop.f32.mrb[11].mxu0  ;;  %v1489_v51 = vpop.f32.mrb[11].mxu1  ;;  %v2692_v60 = vadd.f32 %v1487_v44, %v3204_v38 }
 0x618   :  { %v2677_v52 = vadd.f32 %v1418_v46, %v3198_v14  ;;  %v2693_v59 = vadd.f32 %v1489_v51, %v3202_v37  ;;  %v1881_v46 = vld [vmem:[#allocation9 + $0x20] sm:$0xff]  ;;  %v1882_v51 = vld [vmem:[#allocation9 + $0x28] sm:$0xff] }
 0x619   :  { %v1496_v53 = vmul.f32 0.5, %v2676_v45  ;;  %v1498_v8 = vmul.f32 0.5, %v2692_v60  ;;  %v1885_v60 = vld [vmem:[#allocation9 + $0x40] sm:$0xff] }
 0x61a   :  { %v1497_v54 = vmul.f32 0.5, %v2677_v52  ;;  %v2640_v52 = vpack.c.bf16 %v1882_v51, %v1881_v46 }
 0x61b   :  { %2788 = vtanh.f32 %v1496_v53  ;;  %v1883_v53 = vld [vmem:[#allocation9 + $0x30] sm:$0xff] }
 0x61c   :  { %2790 = vtanh.f32 %v1497_v54  ;;  %v1884_v54 = vld [vmem:[#allocation9 + $0x38] sm:$0xff] }
 0x61d   :  { %2792 = vtanh.f32 %v2693_v59  ;;  %v2644_v59 = vpack.c.bf16 %v1884_v54, %v1883_v53 }
 0x61e   :  { %2794 = vtanh.f32 %v1498_v8  ;;  %v1886_v8 = vld [vmem:[#allocation9 + $0x48] sm:$0xff] }
 0x625   :  { %v2789_v1 = vpop.eup %2788 }
 0x626   :  { %v1504_v63 = vmul.f32 0.5, %v2789_v1  ;;  %v2791_v2 = vpop.eup %2790  ;;  %v2648_v1 = vpack.c.bf16 %v1886_v8, %v1885_v60 }
 0x627   :  { %v1505_v4 = vmul.f32 0.5, %v2791_v2  ;;  %v2793_v10 = vpop.eup %2792  ;;  %v1888_v2 = vld [vmem:[#allocation9 + $0x58] sm:$0xff] }
 0x628   :  { %v1508_v3 = vadd.f32 0.5, %v1504_v63  ;;  %v2795_v33 = vpop.eup %2794  ;;  %v1887_v63 = vld [vmem:[#allocation9 + $0x50] sm:$0xff] }
 0x629   :  { %v1509_v21 = vadd.f32 0.5, %v1505_v4  ;;  %v1506_v36 = vmul.f32 0.5, %v2795_v33  ;;  %v1889_v4 = vld [vmem:[#allocation9 + $0x60] sm:$0xff] }
 0x62a   :  { %v1512_v17 = vmul.f32 %v1508_v3, %v3395_v5  ;;  %v2652_v3 = vpack.c.bf16 %v1888_v2, %v1887_v63 }
 0x62b   :  { %v1513_v29 = vmul.f32 %v2793_v10, %v1509_v21  ;;  %v1510_v20 = vadd.f32 0.5, %v1506_v36  ;;  %v1891_v21 = vld [vmem:[#allocation9 + $0x70] sm:$0xff]  ;;  %v1892_v10 = vld [vmem:[#allocation9 + $0x78] sm:$0xff] }
 0x62d   :  { %v3441_v11 = vadd.f32 %v1513_v29, %v1512_v17  ;;  %v1890_v17 = vld [vmem:[#allocation9 + $0x68] sm:$0xff]  ;;  %v2660_v29 = vpack.c.bf16 %v1892_v10, %v1891_v21 }
 0x62f   :  { %2796 = vtanh.f32 %v3441_v11 }
 0x639   :  { %v2797_v44 = vpop.eup %2796 }
 0x63a   :  { %v3444_v45 = vmul.f32 %v2797_v44, %v1510_v20 }
 0x63c   :  { %1589 = vmatmul.mubr.f32.vlgmr.msra.gmra.mrb[12].mxu0 %v3444_v45  ;;  %1660 = vmatmul.mubr.f32.vlgmr.msra.gmra.mrb[12].mxu1 %v3444_v45 }
 0x63d   :  { %2571 = vmatpush1.bf16.msra.mxu0 %v2980_v9  ;;  %2603 = vmatpush1.bf16.msra.mxu1 %v3108_v6  ;;  %v1878_v9 = vld [vmem:[#allocation9 + $0x8] sm:$0xff] }
 0x63e   :  { %2573 = vmatprep.subr.bf16.mxu0 %v2983_v12  ;;  %2605 = vmatprep.subr.bf16.mxu1 %v3111_v7 }
 0x63f   :  { %1762 = vmatprep.mubr.f32.mxu0 %v2896_v0  ;;  %1833 = vmatprep.mubr.f32.mxu1 %v2896_v0  ;;  %v1877_v0 = vld [vmem:[#allocation9] sm:$0xff] }
 0x640   :  { %v2632_v12 = vpack.c.bf16 %v1878_v9, %v1877_v0 }
 0x641   :  { %2575 = vmatpush1.bf16.msra.mxu0 %v2993_v18  ;;  %2607 = vmatpush1.bf16.msra.mxu1 %v3120_v15 }
 0x642   :  { %2577 = vmatprep.subr.bf16.mxu0 %v2996_v19  ;;  %2609 = vmatprep.subr.bf16.mxu1 %v3124_v16 }
 0x645   :  { %2579 = vmatpush1.bf16.msra.mxu0 %v3006_v25  ;;  %2611 = vmatpush1.bf16.msra.mxu1 %v3132_v23 }
 0x646   :  { %2581 = vmatprep.subr.bf16.mxu0 %v3009_v26  ;;  %2613 = vmatprep.subr.bf16.mxu1 %v3135_v24 }
 0x649   :  { %2583 = vmatpush1.bf16.msra.mxu0 %v3023_v34  ;;  %2615 = vmatpush1.bf16.msra.mxu1 %v3142_v31 }
 0x64a   :  { %2585 = vmatprep.subr.bf16.mxu0 %v3026_v35  ;;  %2617 = vmatprep.subr.bf16.mxu1 %v3145_v32 }
 0x64d   :  { %2587 = vmatpush1.bf16.msra.mxu0 %v3040_v41  ;;  %2619 = vmatpush1.bf16.msra.mxu1 %v3152_v39 }
 0x64e   :  { %2589 = vmatprep.subr.bf16.mxu0 %v3043_v42  ;;  %2621 = vmatprep.subr.bf16.mxu1 %v3155_v40 }
 0x651   :  { %2591 = vmatpush1.bf16.msra.mxu0 %v3058_v48  ;;  %2623 = vmatpush1.bf16.msra.mxu1 %v3158_v47  ;;  %v1879_v47 = vld [vmem:[#allocation9 + $0x10] sm:$0xff] }
 0x652   :  { %2593 = vmatprep.subr.bf16.mxu0 %v3061_v49  ;;  %2625 = vmatprep.subr.bf16.mxu1 %v3161_v50  ;;  %v1880_v50 = vld [vmem:[#allocation9 + $0x18] sm:$0xff] }
 0x653   :  { %v2636_v5 = vpack.c.bf16 %v1880_v50, %v1879_v47 }
 0x655   :  { %2595 = vmatpush1.bf16.msra.mxu0 %v3074_v55  ;;  %2627 = vmatpush1.bf16.msra.mxu1 %v3164_v57 }
 0x656   :  { %2597 = vmatprep.subr.bf16.mxu0 %v3077_v56  ;;  %2629 = vmatprep.subr.bf16.mxu1 %v3167_v58 }
 0x659   :  { %2599 = vmatpush1.bf16.msra.mxu0 %v3090_v62  ;;  %2631 = vmatpush1.bf16.msra.mxu1 %v3170_v61 }
 0x65a   :  { %2633 = vmatprep.subr.bf16.mxu0 %v2632_v12 }
 0x70f   :  { %v1590_v18 = vpop.f32.mrb[12].mxu0  ;;  %v1661_v19 = vpop.f32.mrb[12].mxu1 }
 0x710   :  { %v2678_v25 = vadd.f32 %v1590_v18, %v3196_v13  ;;  %v1592_v26 = vpop.f32.mrb[13].mxu0  ;;  %v1663_v34 = vpop.f32.mrb[13].mxu1  ;;  %v2694_v49 = vadd.f32 %v1661_v19, %v3204_v38 }
 0x711   :  { %v2679_v35 = vadd.f32 %v1592_v26, %v3198_v14  ;;  %v2695_v48 = vadd.f32 %v1663_v34, %v3202_v37 }
 0x712   :  { %v1670_v41 = vmul.f32 0.5, %v2678_v25  ;;  %v1672_v55 = vmul.f32 0.5, %v2694_v49 }
 0x713   :  { %v1671_v42 = vmul.f32 0.5, %v2679_v35 }
 0x714   :  { %2798 = vtanh.f32 %v1670_v41 }
 0x715   :  { %2800 = vtanh.f32 %v1671_v42 }
 0x716   :  { %2802 = vtanh.f32 %v2695_v48 }
 0x717   :  { %2804 = vtanh.f32 %v1672_v55 }
 0x71e   :  { %v2799_v56 = vpop.eup %2798 }
 0x71f   :  { %v1678_v62 = vmul.f32 0.5, %v2799_v56  ;;  %v2801_v6 = vpop.eup %2800 }
 0x720   :  { %v1679_v15 = vmul.f32 0.5, %v2801_v6  ;;  %v2803_v24 = vpop.eup %2802 }
 0x721   :  { %v1682_v7 = vadd.f32 0.5, %v1678_v62  ;;  %v2805_v39 = vpop.eup %2804 }
 0x722   :  { %v1683_v23 = vadd.f32 0.5, %v1679_v15  ;;  %v1680_v40 = vmul.f32 0.5, %v2805_v39 }
 0x723   :  { %v1686_v16 = vmul.f32 %v1682_v7, %v3441_v11 }
 0x724   :  { %v1687_v31 = vmul.f32 %v2803_v24, %v1683_v23  ;;  %v1684_v57 = vadd.f32 0.5, %v1680_v40 }
 0x726   :  { %v3485_v32 = vadd.f32 %v1687_v31, %v1686_v16 }
 0x728   :  { %2806 = vtanh.f32 %v3485_v32 }
 0x732   :  { %v2807_v58 = vpop.eup %2806 }
 0x733   :  { %v1690_v61 = vmul.f32 %v2807_v58, %v1684_v57 }
 0x735   :  { %1763 = vmatmul.mubr.f32.vlgmr.msra.gmra.mrb[14].mxu0 %v1690_v61  ;;  %1834 = vmatmul.mubr.f32.vlgmr.msra.gmra.mrb[14].mxu1 %v1690_v61 }
 0x736   :  { %2635 = vmatpush3.bf16.msra.mxu0 %v2632_v12  ;;  %2108 = vmatprep.mubr.f32.mxu0 %v3214_v22  ;;  %v2656_v22 = vpack.c.bf16 %v1890_v17, %v1889_v4 }
 0x737   :  { %2637 = vmatprep.subr.bf16.mxu0 %v2636_v5 }
 0x73a   :  { %2639 = vmatpush3.bf16.msra.mxu0 %v2636_v5 }
 0x73b   :  { %2641 = vmatprep.subr.bf16.mxu0 %v2640_v52 }
 0x73e   :  { %2643 = vmatpush3.bf16.msra.mxu0 %v2640_v52 }
 0x73f   :  { %2645 = vmatprep.subr.bf16.mxu0 %v2644_v59 }
 0x742   :  { %2647 = vmatpush3.bf16.msra.mxu0 %v2644_v59 }
 0x743   :  { %2649 = vmatprep.subr.bf16.mxu0 %v2648_v1 }
 0x746   :  { %2651 = vmatpush3.bf16.msra.mxu0 %v2648_v1 }
 0x747   :  { %2653 = vmatprep.subr.bf16.mxu0 %v2652_v3 }
 0x74a   :  { %2655 = vmatpush3.bf16.msra.mxu0 %v2652_v3 }
 0x74b   :  { %2657 = vmatprep.subr.bf16.mxu0 %v2656_v22 }
 0x74e   :  { %2659 = vmatpush3.bf16.msra.mxu0 %v2656_v22 }
 0x74f   :  { %2661 = vmatprep.subr.bf16.mxu0 %v2660_v29 }
 0x752   :  { %2663 = vmatpush3.bf16.msra.mxu0 %v2660_v29 }
 0x755   :  { %2109 = vmatmul.mubr.f32.vlgmr.msra.gmra.mrb[16].mxu0 %v3260_v27 }
 0x756   :  { %2111 = vmatprep.mubr.f32.mxu0 %v3306_v28 }
 0x759   :  { %2112 = vmatmul.mubr.f32.gmra.mrb[18].mxu0 %v3352_v30 }
 0x75a   :  { %2114 = vmatprep.mubr.f32.mxu0 %v3398_v43 }
 0x75d   :  { %2115 = vmatmul.mubr.f32.gmra.mrb[20].mxu0 %v3444_v45 }
 0x75e   :  { %2117 = vmatprep.mubr.f32.mxu0 %v1690_v61 }
 0x808   :  { %v1764_v11 = vpop.f32.mrb[14].mxu0  ;;  %v1835_v33 = vpop.f32.mrb[14].mxu1 }
 0x809   :  { %v2680_v36 = vadd.f32 %v1764_v11, %v3196_v13  ;;  %v1766_v20 = vpop.f32.mrb[15].mxu0  ;;  %v1837_v44 = vpop.f32.mrb[15].mxu1  ;;  %v2696_v28 = vadd.f32 %v1835_v33, %v3204_v38 }
 0x80a   :  { %v2681_v0 = vadd.f32 %v1766_v20, %v3198_v14  ;;  %v2697_v27 = vadd.f32 %v1837_v44, %v3202_v37  ;;  %v2051_v37 = vld [vmem:[%s3524_s7] ss:$0 sm:$0xff]  ;;  %s2897_s7 = smov [#allocation11]  }
 0x80b   :  { %v1844_v9 = vmul.f32 0.5, %v2680_v36  ;;  %v1846_v30 = vmul.f32 0.5, %v2696_v28  ;;  %s2018_s11 = sshll.u32 %s2897_s7, 4  ;;  %s2019_s11 = int_to_ptr.vmem [resolvable:$true] %s2018_s11 }
 0x80c   :  { %v1845_v12 = vmul.f32 0.5, %v2681_v0  ;;  %s2862_s6 = scalar_lea.vmem %s2019_s11, 1024  ;;  %p2867_p3 = scmp.lt.s32.totalorder %s2019_s11, %s2019_s11 }
 0x80d   :  { %2808 = vtanh.f32 %v1844_v9  ;;  %p2863_p2 = scmp.ne.s32.totalorder %s2019_s11, %s2862_s6  ;;  %p2868_p4 = scmp.lt.s32.totalorder %s2862_s6, %s2862_s6 }
 0x80e   :  { %2810 = vtanh.f32 %v1845_v12 }
 0x80f   :  { %2812 = vtanh.f32 %v2697_v27  ;;  %p2869_p5 = por %p2868_p4, %p2867_p3 }
 0x810   :  { %2814 = vtanh.f32 %v1846_v30 }
 0x811   :  { %p2870_p6 = pnand %p2869_p5, %p2863_p2 }
 0x817   :  { %v2809_v43 = vpop.eup %2808 }
 0x818   :  { %v1852_v45 = vmul.f32 0.5, %v2809_v43  ;;  %v2811_v18 = vpop.eup %2810 }
 0x819   :  { %v1853_v13 = vmul.f32 0.5, %v2811_v18  ;;  %v2813_v14 = vpop.eup %2812 }
 0x81a   :  { %v1856_v19 = vadd.f32 0.5, %v1852_v45  ;;  %v2815_v41 = vpop.eup %2814 }
 0x81b   :  { %v1857_v26 = vadd.f32 0.5, %v1853_v13  ;;  %v1854_v38 = vmul.f32 0.5, %v2815_v41 }
 0x81c   :  { %v1860_v25 = vmul.f32 %v1856_v19, %v3485_v32 }
 0x81d   :  { %v1861_v34 = vmul.f32 %v2813_v14, %v1857_v26  ;;  %v1858_v56 = vadd.f32 0.5, %v1854_v38 }
 0x81f   :  { %v1862_v35 = vadd.f32 %v1861_v34, %v1860_v25 }
 0x821   :  { %2816 = vtanh.f32 %v1862_v35 }
 0x828   :  { %v2110_v42 = vpop.f32.mrb[16].mxu0 }
 0x829   :  { %v1972_v48 = vadd.f32 %v2110_v42, %v2051_v37  ;;  %v1966_v49 = vpop.f32.mrb[17].mxu0 }
 0x82a   :  { %v1967_v55 = vadd.f32 %v2051_v37, %v1966_v49 }
 0x82b   :  { %2006 = vst [vmem:[#allocation11 + $0x8] sm:$0xff] %v1972_v48  ;;  %v2817_v62 = vpop.eup %2816 }
 0x82c   :  { %2005 = vst [vmem:[#allocation11] sm:$0xff] %v1967_v55  ;;  %v2113_v6 = vpop.f32.mrb[18].mxu0  ;;  %v1864_v16 = vmul.f32 %v2817_v62, %v1858_v56 }
 0x82d   :  { %v1982_v7 = vadd.f32 %v2113_v6, %v2051_v37  ;;  %v1976_v15 = vpop.f32.mrb[19].mxu0 }
 0x82e   :  { %v1977_v23 = vadd.f32 %v2051_v37, %v1976_v15  ;;  %2118 = vmatmul.mubr.f32.gmra.mrb[22].mxu0 %v1864_v16 }
 0x82f   :  { %2008 = vst [vmem:[#allocation11 + $0x18] sm:$0xff] %v1982_v7 }
 0x830   :  { %2007 = vst [vmem:[#allocation11 + $0x10] sm:$0xff] %v1977_v23  ;;  %v2116_v24 = vpop.f32.mrb[20].mxu0 }
 0x831   :  { %v1992_v31 = vadd.f32 %v2116_v24, %v2051_v37  ;;  %v1986_v32 = vpop.f32.mrb[21].mxu0 }
 0x832   :  { %v1987_v39 = vadd.f32 %v2051_v37, %v1986_v32 }
 0x833   :  { %2010 = vst [vmem:[#allocation11 + $0x28] sm:$0xff] %v1992_v31 }
 0x834   :  { %2009 = vst [vmem:[#allocation11 + $0x20] sm:$0xff] %v1987_v39 }
 0x901   :  { %v2119_v40 = vpop.f32.mrb[22].mxu0 }
 0x902   :  { %v2002_v47 = vadd.f32 %v2119_v40, %v2051_v37  ;;  %v1996_v50 = vpop.f32.mrb[23].mxu0 }
 0x903   :  { %v1997_v57 = vadd.f32 %v2051_v37, %v1996_v50 }
 0x904   :  { %2012 = vst [vmem:[#allocation11 + $0x38] sm:$0xff] %v2002_v47 }
 0x905   :  { %2011 = vst [vmem:[#allocation11 + $0x30] sm:$0xff] %v1997_v57 }
 0x906   :  { %2873 = shalt.err (!%p2870_p6)
}
 0x907   :  { %s2874_s14 = scalar_lea.hbm %s3525_s8, 1024 }
 0x908   :  { %p2875_p7 = scmp.ne.s32.totalorder %s3525_s8, %s2874_s14  ;;  %p2878_p8 = scmp.lt.u32.totalorder %s2874_s14, %s3525_s8 }
 0x90a   :  { %p2880_p9 = pnand %p2878_p8, %p2875_p7 }
 0x90c   :  { %2883 = shalt.err (!%p2880_p9)
}
 0x90d   :  { %2024 = dma.vmem_to_hbm [thread:$0]  %s2019_s11, 1024, %s3525_s8, [#allocation8], %s2894_s5, %s2894_s5, %s2895_s28  }
 0x90e   :  { %2888 = dma.done.wait [#allocation8], 1024  }
 0x90f   :  { %2889 = vsyncadd [#allocation8], 4294966272 }
 0x910   :  { %2028 = vsyncpa [#allocation7], 1 }
 0x911   :  { %2029 = vsyncpa [#allocation10], 1 }
 0x912   :  { %2030 = vsyncpa [#allocation8], 1 }

</bundles_post_ra>
